<compile_context>
chip_gen: v7x
topology: tpu7x:2x2x1
jax: 0.10.0
libtpu: 0.0.40
codegen_flags: <defaults>
</compile_context>

<pallas_src>
import math
import functools

import jax
import jax.numpy as jnp
from jax.experimental import pallas as pl
from jax.experimental.pallas import tpu as pltpu


def _round_up(a: int, b: int) -> int:
    return ((a + b - 1) // b) * b


# ----------------------------------------------------------------------------
# Kernel body: one (tn, F_in_p) x tile  @  (F_in_p, tf) weight tile
# ----------------------------------------------------------------------------
def _sine_kernel(x_ref, w_ref, b_ref, o_ref, *, omega_0, mm_dtype):
    # Cast x on the VPU inside the kernel (avoids a wrapper-side HBM pass).
    x = x_ref[...].astype(mm_dtype)
    y = jnp.dot(x, w_ref[...], preferred_element_type=jnp.float32)   # MXU, f32 acc
    # bias add + omega scale + sin in f32 (safe on v5e; EUP/VPU work).
    o_ref[...] = jnp.sin(omega_0 * (y + b_ref[...])).astype(o_ref.dtype)


# ----------------------------------------------------------------------------
# One-time parameter prep (hoist out of the per-call path / training loop)
# ----------------------------------------------------------------------------
def prepare_sine_params(weight, bias, compute_dtype=jnp.bfloat16):
    """Transpose + cast + lane-pad the weight/bias ONCE.

    weight: [F_out, F_in] (PyTorch nn.Linear layout), bias: [F_out]
    Returns (w_p [F_in_p, F_out_p] in compute_dtype, b_p [1, F_out_p] f32, F_out).
    """
    F_out, F_in = weight.shape
    F_in_p = _round_up(F_in, 128)
    F_out_p = _round_up(F_out, 128)
    mm_dtype = compute_dtype if compute_dtype is not None else weight.dtype

    w_p = weight.T.astype(mm_dtype)
    if (F_in_p, F_out_p) != (F_in, F_out):
        w_p = jnp.pad(w_p, ((0, F_in_p - F_in), (0, F_out_p - F_out)))

    b_p = bias.astype(jnp.float32).reshape(1, F_out)
    if F_out_p != F_out:
        b_p = jnp.pad(b_p, ((0, 0), (0, F_out_p - F_out)))
    return w_p, b_p, F_out


# ----------------------------------------------------------------------------
# Forward with pre-prepared parameters (fast path)
# ----------------------------------------------------------------------------
def sine_layer_pallas_prepared(x, w_p, b_p, f_out, omega_0=30.0, *,
                               tile_n=1024, tile_fout=512,
                               weight_resident_bytes=4 << 20,
                               out_dtype=None):
    """sin(omega_0 * (x @ W.T + b)) with W/b already prepared.

    x:   [N, F_in]            (original dtype; cast to w_p.dtype inside kernel)
    w_p: [F_in_p, F_out_p]    (from prepare_sine_params)
    b_p: [1, F_out_p] f32
    """
    N, F_in = x.shape
    F_in_p, F_out_p = w_p.shape
    assert F_in_p == _round_up(F_in, 128), "w_p K-padding does not match x"
    mm_dtype = w_p.dtype
    out_dtype = jnp.dtype(out_dtype) if out_dtype is not None else x.dtype

    # ---- row tiling: big 128-multiple tiles, keep >=2 grid steps (2 TCs) ----
    N_p128 = _round_up(max(N, 1), 128)
    tn = min(tile_n, N_p128)
    if N_p128 // tn < 2 and N_p128 >= 256:
        tn = _round_up(N_p128 // 2, 128)
    N_pad = _round_up(N, tn)

    # ---- only pad x when actually needed (aligned case = zero-copy) ---------
    if (N_pad, F_in_p) != (N, F_in):
        x_in = jnp.pad(x, ((0, N_pad - N), (0, F_in_p - F_in)))
    else:
        x_in = x

    # ---- F_out tiling: keep whole weight resident when small ----------------
    w_isz = jnp.dtype(mm_dtype).itemsize
    if F_in_p * F_out_p * w_isz <= weight_resident_bytes:
        tf = F_out_p
    else:
        tf = 128
        start = max((min(tile_fout, F_out_p) // 128) * 128, 128)
        for cand in range(start, 127, -128):
            if F_out_p % cand == 0:
                tf = cand
                break
    grid_i = N_pad // tn
    grid_j = F_out_p // tf

    # ---- VMEM budget (double-buffered tiles + f32 intermediates), cap 48MiB --
    x_isz = jnp.dtype(x_in.dtype).itemsize
    o_isz = jnp.dtype(out_dtype).itemsize
    blk_bytes = (2 * tn * F_in_p * x_isz           # x tiles (double buffered)
                 + 2 * F_in_p * tf * w_isz         # weight tiles
                 + 2 * tf * 4                      # bias tiles (f32)
                 + 2 * tn * tf * o_isz             # output tiles
                 + tn * tf * 4                     # f32 matmul intermediate
                 + tn * F_in_p * 2)                # in-kernel cast of x
    vmem_limit = int(min(max(blk_bytes + (16 << 20), 32 << 20), 48 << 20))

    cost = pl.CostEstimate(
        flops=2 * N_pad * F_in_p * F_out_p,
        transcendentals=N_pad * F_out_p,
        bytes_accessed=(N_pad * F_in_p * x_isz + F_in_p * F_out_p * w_isz
                        + F_out_p * 4 + N_pad * F_out_p * o_isz),
    )

    kernel = functools.partial(_sine_kernel, omega_0=float(omega_0),
                               mm_dtype=mm_dtype)

    if grid_j == 1:
        # Weight fully resident: 1-D grid over row tiles, W/b fetched once.
        grid = (grid_i,)
        in_specs = [
            pl.BlockSpec((tn, F_in_p), lambda i: (i, 0)),        # x row tile
            pl.BlockSpec((F_in_p, F_out_p), lambda i: (0, 0)),   # full weight
            pl.BlockSpec((1, F_out_p), lambda i: (0, 0)),        # full bias
        ]
        out_specs = pl.BlockSpec((tn, F_out_p), lambda i: (i, 0))
        dims = ("parallel",)
    else:
        # Wide layer: tile F_out; j OUTER so the weight block index is constant
        # across the inner row sweep (weight DMA'd once per j, not per (i,j)).
        grid = (grid_j, grid_i)
        in_specs = [
            pl.BlockSpec((tn, F_in_p), lambda j, i: (i, 0)),
            pl.BlockSpec((F_in_p, tf), lambda j, i: (0, j)),
            pl.BlockSpec((1, tf), lambda j, i: (0, j)),
        ]
        out_specs = pl.BlockSpec((tn, tf), lambda j, i: (i, j))
        dims = ("parallel", "parallel")

    out_p = pl.pallas_call(
        kernel,
        out_shape=jax.ShapeDtypeStruct((N_pad, F_out_p), out_dtype),
        grid=grid,
        in_specs=in_specs,
        out_specs=out_specs,
        compiler_params=pltpu.CompilerParams(
            dimension_semantics=dims,
            vmem_limit_bytes=vmem_limit,
        ),
        cost_estimate=cost,
    )(x_in, w_p, b_p)

    if (N_pad, F_out_p) != (N, f_out):
        out_p = out_p[:N, :f_out]
    return out_p


# ----------------------------------------------------------------------------
# Convenience wrapper matching SineLayer.forward
# ----------------------------------------------------------------------------
def sine_layer_pallas(x, weight, bias, omega_0=30.0, *,
                      compute_dtype=jnp.bfloat16, out_dtype=None, **kw):
    """SIREN SineLayer forward: sin(omega_0 * (x @ W.T + b)).

    For a first SIREN layer (raw coordinates), pass compute_dtype=jnp.float32
    to avoid bf16 phase error after the omega_0 scale.
    In a real training loop, call prepare_sine_params() once and use
    sine_layer_pallas_prepared() to skip the recurring weight transpose/pad.
    """
    w_p, b_p, f_out = prepare_sine_params(weight, bias, compute_dtype)
    return sine_layer_pallas_prepared(x, w_p, b_p, f_out, omega_0,
                                      out_dtype=out_dtype, **kw)


def init_sine_layer_params(key, in_features, out_features, is_first=False,
                           omega_0=30.0, dtype=jnp.float32):
    """Deterministic SIREN-style init matching SineLayer.init_weights."""
    kw, kb = jax.random.split(key)
    if is_first:
        bound_w = 1.0 / in_features
    else:
        bound_w = math.sqrt(6.0 / in_features) / omega_0
    weight = jax.random.uniform(kw, (out_features, in_features), dtype,
                                minval=-bound_w, maxval=bound_w)
    # nn.Linear default bias init: U(-1/sqrt(in), 1/sqrt(in))
    bound_b = 1.0 / math.sqrt(in_features)
    bias = jax.random.uniform(kb, (out_features,), dtype,
                              minval=-bound_b, maxval=bound_b)
    return weight, bias


if __name__ == "__main__":
    key = jax.random.PRNGKey(0)
    omega_0 = 30.0

    def ref_fn(x, w, b):
        return jnp.sin(omega_0 * (x @ w.T + b))

    k1, k2, k3, k4, k5, k6 = jax.random.split(key, 6)

    # --- test 1: tiny, unaligned features (padding path), exact f32 MXU ------
    N, F_in, F_out = 16, 32, 32
    x = jax.random.normal(k1, (N, F_in), jnp.float32)
    w, b = init_sine_layer_params(k2, F_in, F_out, is_first=False, omega_0=omega_0)
    out = jax.block_until_ready(
        sine_layer_pallas(x, w, b, omega_0, compute_dtype=jnp.float32))
    assert out.shape == (N, F_out)
    assert jnp.allclose(out, ref_fn(x, w, b), atol=1e-5, rtol=1e-5)

    # --- test 2: same shapes, bf16 MXU inputs (perf path), loose check -------
    out_bf = jax.block_until_ready(
        sine_layer_pallas(x, w, b, omega_0, compute_dtype=jnp.bfloat16))
    assert out_bf.shape == (N, F_out)
    assert jnp.allclose(out_bf.astype(jnp.float32), ref_fn(x, w, b), atol=5e-2)

    # --- test 3: multi-tile, unaligned N/F_in/F_out, forced F_out tiling -----
    N3, F_in3, F_out3 = 1000, 300, 260
    x3 = jax.random.normal(k3, (N3, F_in3), jnp.float32)
    w3, b3 = init_sine_layer_params(k4, F_in3, F_out3, is_first=False,
                                    omega_0=omega_0)
    w3p, b3p, fo3 = prepare_sine_params(w3, b3, compute_dtype=jnp.float32)
    out3 = jax.block_until_ready(
        sine_layer_pallas_prepared(x3, w3p, b3p, fo3, omega_0,
                                   weight_resident_bytes=0,  # force 2-D grid
                                   tile_fout=128))
    assert out3.shape == (N3, F_out3)
    assert jnp.allclose(out3, ref_fn(x3, w3, b3), atol=1e-4, rtol=1e-4)

    # --- test 4: fully aligned shapes -> zero wrapper pad/slice, bf16 out ----
    N4, F_in4, F_out4 = 256, 256, 128
    x4 = jax.random.normal(k5, (N4, F_in4), jnp.float32)
    w4, b4 = init_sine_layer_params(k6, F_in4, F_out4, omega_0=omega_0)
    out4 = jax.block_until_ready(
        sine_layer_pallas(x4, w4, b4, omega_0,
                          compute_dtype=jnp.bfloat16, out_dtype=jnp.bfloat16))
    assert out4.shape == (N4, F_out4) and out4.dtype == jnp.bfloat16
    assert jnp.allclose(out4.astype(jnp.float32), ref_fn(x4, w4, b4), atol=5e-2)

    print("KERNEL_OK")
</pallas_src>

<mosaic_0001>
module attributes {stable_mosaic.version = 11 : i64} {
  func.func @_sine_kernel(%arg0: i32, %arg1: memref<128x128xf32, #tpu.memory_space<vmem>>, %arg2: memref<128x128xf32, #tpu.memory_space<vmem>>, %arg3: memref<1x128xf32, #tpu.memory_space<vmem>>, %arg4: memref<128x128xf32, #tpu.memory_space<vmem>>) attributes {dimension_semantics = [#tpu.dimension_semantics<parallel>], iteration_bounds = array<i64: 1>, scalar_prefetch = 0 : i64, scratch_operands = 0 : i64, tpu.core_type = #tpu.core_type<tc>, window_params = [{transform_indices = @transform_0, window_bounds = array<i64: 128, 128>}, {pipeline_mode = #tpu.pipeline_mode<synchronous>, transform_indices = @transform_1, window_bounds = array<i64: 128, 128>}, {pipeline_mode = #tpu.pipeline_mode<synchronous>, transform_indices = @transform_2, window_bounds = array<i64: 1, 128>}, {transform_indices = @transform_3, window_bounds = array<i64: 128, 128>}]} {
    %c0 = arith.constant 0 : index
    %c0_0 = arith.constant 0 : index
    %0 = vector.load %arg1[%c0, %c0_0] : memref<128x128xf32, #tpu.memory_space<vmem>>, vector<128x128xf32>
    %c0_1 = arith.constant 0 : index
    %c0_2 = arith.constant 0 : index
    %1 = vector.load %arg2[%c0_1, %c0_2] : memref<128x128xf32, #tpu.memory_space<vmem>>, vector<128x128xf32>
    %cst = arith.constant dense<0.000000e+00> : vector<128x128xf32>
    %2 = tpu.matmul %0, %1, %cst {dimension_numbers = #tpu.dot_dimension_numbers<[1], [0], [0], [1], [0, 0, 1, 1], [], []>} : vector<128x128xf32>, vector<128x128xf32>, vector<128x128xf32> -> vector<128x128xf32>
    %c0_3 = arith.constant 0 : index
    %c0_4 = arith.constant 0 : index
    %3 = vector.load %arg3[%c0_3, %c0_4] : memref<1x128xf32, #tpu.memory_space<vmem>>, vector<1x128xf32>
    %4 = vector.broadcast %3 : vector<1x128xf32> to vector<128x128xf32>
    %5 = arith.addf %2, %4 : vector<128x128xf32>
    %cst_5 = arith.constant 3.000000e+01 : f32
    %6 = vector.broadcast %cst_5 : f32 to vector<128x128xf32>
    %7 = arith.mulf %6, %5 : vector<128x128xf32>
    %8 = math.sin %7 : vector<128x128xf32>
    %c0_6 = arith.constant 0 : index
    %c0_7 = arith.constant 0 : index
    %9 = vector.load %arg4[%c0_6, %c0_7] : memref<128x128xf32, #tpu.memory_space<vmem>>, vector<128x128xf32>
    tpu.vector_store %arg4[%c0_6, %c0_7], %8 {strides = array<i32>} : memref<128x128xf32, #tpu.memory_space<vmem>>, vector<128x128xf32>,
    return
  }
  func.func @transform_0(%arg0: i32) -> (i32, i32) {
    %c0_i32 = arith.constant 0 : i32
    %c0_i32_0 = arith.constant 0 : i32
    return %arg0, %c0_i32 : i32, i32
  }
  func.func @transform_1(%arg0: i32) -> (i32, i32) {
    %c0_i32 = arith.constant 0 : i32
    %c0_i32_0 = arith.constant 0 : i32
    %c0_i32_1 = arith.constant 0 : i32
    return %c0_i32, %c0_i32_0 : i32, i32
  }
  func.func @transform_2(%arg0: i32) -> (i32, i32) {
    %c0_i32 = arith.constant 0 : i32
    %c0_i32_0 = arith.constant 0 : i32
    %c0_i32_1 = arith.constant 0 : i32
    return %c0_i32, %c0_i32_0 : i32, i32
  }
  func.func @transform_3(%arg0: i32) -> (i32, i32) {
    %c0_i32 = arith.constant 0 : i32
    %c0_i32_0 = arith.constant 0 : i32
    return %arg0, %c0_i32 : i32, i32
  }
}

</mosaic_0001>

<bundles_post_ra>
// kernel: tpu_custom_call.1
= control target key start
LH: loop header
LB: loop body
LE: loop exit
PB: predicated region body
PF: predicated region fallthrough
CT: control target
= control target key end

     0   :  { %8 = vsyncpa [#allocation3], 0  ;;  %s3755_s0 = inlined_call_operand.hbm [shape: f32[128,128], index: 0, kind: input, shape index: {}]   ;;  %s3756_s1 = inlined_call_operand.hbm [shape: f32[128,128], index: 1, kind: input, shape index: {}]   ;;  %s3757_s2 = inlined_call_operand.vmem [shape: f32[1,128], index: 2, kind: input, shape index: {}]   ;;  %s3758_s3 = inlined_call_operand.hbm [shape: f32[128,128], index: 3, kind: output, shape index: {}]  }
   0x1   :  { %9 = vsyncpa [#allocation6], 0 }
   0x2   :  { %10 = vsyncpa [#allocation4], 0  ;;  %s2355_s12 = smov [#allocation2]   ;;  %s2283_s16 = scalar_lea.hbm %s3755_s0, 2048 }
   0x3   :  { %s16_s13 = sshll.u32 %s2355_s12, 4  ;;  %p2284_p0 = scmp.ne.s32.totalorder %s3755_s0, %s2283_s16  ;;  %s17_s13 = int_to_ptr.vmem [resolvable:$true] %s16_s13 }
   0x4   :  { %p2287_p1 = scmp.lt.u32.totalorder %s2283_s16, %s3755_s0 }
   0x6   :  { %p2289_p2 = pnand %p2287_p1, %p2284_p0 }
   0x8   :  { %2292 = shalt.err (!%p2289_p2)
}
   0x9   :  { %s2293_s21 = scalar_lea.vmem %s17_s13, 2048  ;;  %p2298_p4 = scmp.lt.s32.totalorder %s17_s13, %s17_s13 }
   0xa   :  { %p2294_p3 = scmp.ne.s32.totalorder %s17_s13, %s2293_s21  ;;  %p2299_p5 = scmp.lt.s32.totalorder %s2293_s21, %s2293_s21 }
   0xc   :  { %p2300_p6 = por %p2299_p5, %p2298_p4 }
   0xe   :  { %p2301_p7 = pnand %p2300_p6, %p2294_p3 }
  0x10   :  { %2304 = shalt.err (!%p2301_p7)
}
  0x11   :  { %s2356_s22 = smov 128   ;;  %s2357_s23 = smov 8  }
  0x12   :  { %22 = dma.hbm_to_vmem [thread:$0]  %s3755_s0, 2048, %s17_s13, [#allocation3], %s2356_s22, %s2356_s22, %s2357_s23  }
  0x13   :  { %s2358_s26 = smov [#allocation5]   ;;  %s2305_s30 = scalar_lea.hbm %s3756_s1, 2048 }
  0x14   :  { %s28_s27 = sshll.u32 %s2358_s26, 4  ;;  %p2306_p8 = scmp.ne.s32.totalorder %s3756_s1, %s2305_s30  ;;  %s29_s27 = int_to_ptr.vmem [resolvable:$true] %s28_s27 }
  0x15   :  { %p2309_p9 = scmp.lt.u32.totalorder %s2305_s30, %s3756_s1 }
  0x17   :  { %p2311_p10 = pnand %p2309_p9, %p2306_p8 }
  0x19   :  { %2314 = shalt.err (!%p2311_p10)
}
  0x1a   :  { %s2315_s8 = scalar_lea.vmem %s29_s27, 2048  ;;  %p2320_p12 = scmp.lt.s32.totalorder %s29_s27, %s29_s27 }
  0x1b   :  { %p2316_p11 = scmp.ne.s32.totalorder %s29_s27, %s2315_s8  ;;  %p2321_p13 = scmp.lt.s32.totalorder %s2315_s8, %s2315_s8 }
  0x1d   :  { %p2322_p0 = por %p2321_p13, %p2320_p12 }
  0x1f   :  { %p2323_p1 = pnand %p2322_p0, %p2316_p11 }
  0x21   :  { %2326 = shalt.err (!%p2323_p1)
}
  0x22   :  { %34 = dma.hbm_to_vmem [thread:$0]  %s3756_s1, 2048, %s29_s27, [#allocation6], %s2356_s22, %s2356_s22, %s2357_s23  }
  0x23   :  { %2349 = dma.done.wait [#allocation3], 2048  }
  0x24   :  { %2350 = vsyncadd [#allocation3], 4294965248 }
  0x25   :  { %2351 = dma.done.wait [#allocation6], 2048  }
  0x26   :  { %2352 = vsyncadd [#allocation6], 4294965248  ;;  %v59_v0 = vld [vmem:[#allocation5] sm:$0xff]  ;;  %v60_v1 = vld [vmem:[#allocation5 + $0x8] sm:$0xff] }
  0x27   :  { %v61_v2 = vld [vmem:[#allocation5 + $0x10] sm:$0xff]  ;;  %v2094_v3 = vpack.c.bf16 %v60_v1, %v59_v0  ;;  %v62_v4 = vld [vmem:[#allocation5 + $0x18] sm:$0xff]  ;;  %v63_v6 = vld [vmem:[#allocation5 + $0x20] sm:$0xff] }
  0x28   :  { %v2098_v5 = vpack.c.bf16 %v62_v4, %v61_v2  ;;  %v64_v7 = vld [vmem:[#allocation5 + $0x28] sm:$0xff]  ;;  %v43_v9 = vld [vmem:[#allocation2] sm:$0xff]  ;;  %v65_v11 = vld [vmem:[#allocation5 + $0x30] sm:$0xff] }
  0x29   :  { %2095 = vmatprep.subr.bf16.mxu0 %v2094_v3  ;;  %2126 = vmatprep.subr.bf16.mxu1 %v2094_v3  ;;  %v2102_v8 = vpack.c.bf16 %v64_v7, %v63_v6  ;;  %v51_v10 = vld [vmem:[#allocation2 + $0x40] sm:$0xff]  ;;  %v66_v12 = vld [vmem:[#allocation5 + $0x38] sm:$0xff]  ;;  %v68_v15 = vld [vmem:[#allocation5 + $0x48] sm:$0xff] }
  0x2a   :  { %2097 = vmatpush3.bf16.msra.mxu0 %v2094_v3  ;;  %2134 = vmatpush3.bf16.msra.mxu1 %v2094_v3  ;;  %v2106_v13 = vpack.c.bf16 %v66_v12, %v65_v11  ;;  %v67_v14 = vld [vmem:[#allocation5 + $0x40] sm:$0xff]  ;;  %v69_v17 = vld [vmem:[#allocation5 + $0x50] sm:$0xff]  ;;  %v70_v18 = vld [vmem:[#allocation5 + $0x58] sm:$0xff] }
  0x2b   :  { %2099 = vmatprep.subr.bf16.mxu0 %v2098_v5  ;;  %2127 = vmatprep.subr.bf16.mxu1 %v2098_v5  ;;  %v2110_v16 = vpack.c.bf16 %v68_v15, %v67_v14  ;;  %v2114_v19 = vpack.c.bf16 %v70_v18, %v69_v17  ;;  %v71_v20 = vld [vmem:[#allocation5 + $0x60] sm:$0xff]  ;;  %v72_v21 = vld [vmem:[#allocation5 + $0x68] sm:$0xff]  ;;  %v73_v23 = vld [vmem:[#allocation5 + $0x70] sm:$0xff] }
  0x2c   :  { %2070 = vmatprep.mubr.f32.mxu0 %v43_v9  ;;  %2082 = vmatprep.mubr.f32.mxu1 %v51_v10  ;;  %v2118_v22 = vpack.c.bf16 %v72_v21, %v71_v20  ;;  %v74_v24 = vld [vmem:[#allocation5 + $0x78] sm:$0xff]  ;;  %v44_v26 = vld [vmem:[#allocation2 + $0x8] sm:$0xff]  ;;  %v45_v28 = vld [vmem:[#allocation2 + $0x10] sm:$0xff]  ;;  %v2359_v20 = vmov 683565275  }
  0x2d   :  { %v2122_v25 = vpack.c.bf16 %v74_v24, %v73_v23  ;;  %v52_v27 = vld [vmem:[#allocation2 + $0x48] sm:$0xff]  ;;  %v53_v29 = vld [vmem:[#allocation2 + $0x50] sm:$0xff]  ;;  %v46_v30 = vld [vmem:[#allocation2 + $0x18] sm:$0xff]  ;;  %v2360_v24 = vmov 2475754826  }
  0x2e   :  { %2101 = vmatpush3.bf16.msra.mxu0 %v2098_v5  ;;  %2135 = vmatpush3.bf16.msra.mxu1 %v2098_v5  ;;  %v54_v31 = vld [vmem:[#allocation2 + $0x58] sm:$0xff]  ;;  %v47_v32 = vld [vmem:[#allocation2 + $0x20] sm:$0xff]  ;;  %v48_v34 = vld [vmem:[#allocation2 + $0x28] sm:$0xff] }
  0x2f   :  { %2103 = vmatprep.subr.bf16.mxu0 %v2102_v8  ;;  %2128 = vmatprep.subr.bf16.mxu1 %v2102_v8  ;;  %v55_v33 = vld [vmem:[#allocation2 + $0x60] sm:$0xff]  ;;  %v56_v35 = vld [vmem:[#allocation2 + $0x68] sm:$0xff]  ;;  %v49_v36 = vld [vmem:[#allocation2 + $0x30] sm:$0xff] }
  0x30   :  { %v57_v37 = vld [vmem:[#allocation2 + $0x70] sm:$0xff]  ;;  %v50_v38 = vld [vmem:[#allocation2 + $0x38] sm:$0xff]  ;;  %v2419_v40 = vld [vmem:[%s3757_s2] ss:$0 sm:$0xff] }
  0x31   :  { %v58_v39 = vld [vmem:[#allocation2 + $0x78] sm:$0xff] }
  0x32   :  { %2105 = vmatpush3.bf16.msra.mxu0 %v2102_v8  ;;  %2136 = vmatpush3.bf16.msra.mxu1 %v2102_v8 }
  0x33   :  { %2107 = vmatprep.subr.bf16.mxu0 %v2106_v13  ;;  %2129 = vmatprep.subr.bf16.mxu1 %v2106_v13 }
  0x36   :  { %2109 = vmatpush3.bf16.msra.mxu0 %v2106_v13  ;;  %2137 = vmatpush3.bf16.msra.mxu1 %v2106_v13 }
  0x37   :  { %2111 = vmatprep.subr.bf16.mxu0 %v2110_v16  ;;  %2130 = vmatprep.subr.bf16.mxu1 %v2110_v16 }
  0x3a   :  { %2113 = vmatpush3.bf16.msra.mxu0 %v2110_v16  ;;  %2138 = vmatpush3.bf16.msra.mxu1 %v2110_v16 }
  0x3b   :  { %2115 = vmatprep.subr.bf16.mxu0 %v2114_v19  ;;  %2131 = vmatprep.subr.bf16.mxu1 %v2114_v19 }
  0x3e   :  { %2117 = vmatpush3.bf16.msra.mxu0 %v2114_v19  ;;  %2139 = vmatpush3.bf16.msra.mxu1 %v2114_v19 }
  0x3f   :  { %2119 = vmatprep.subr.bf16.mxu0 %v2118_v22  ;;  %2132 = vmatprep.subr.bf16.mxu1 %v2118_v22 }
  0x42   :  { %2121 = vmatpush3.bf16.msra.mxu0 %v2118_v22  ;;  %2140 = vmatpush3.bf16.msra.mxu1 %v2118_v22 }
  0x43   :  { %2123 = vmatprep.subr.bf16.mxu0 %v2122_v25  ;;  %2133 = vmatprep.subr.bf16.mxu1 %v2122_v25 }
  0x46   :  { %2125 = vmatpush3.bf16.msra.mxu0 %v2122_v25  ;;  %2141 = vmatpush3.bf16.msra.mxu1 %v2122_v25 }
  0x49   :  { %2071 = vmatmul.mubr.f32.vlgmr.msra.gmra.mrb[0].mxu0 %v44_v26  ;;  %2083 = vmatmul.mubr.f32.vlgmr.msra.gmra.mrb[0].mxu1 %v52_v27  ;;  %v2361_v26 = vmov 2131351028  }
  0x4a   :  { %2073 = vmatprep.mubr.f32.mxu0 %v45_v28  ;;  %2085 = vmatprep.mubr.f32.mxu1 %v53_v29  ;;  %v2362_v28 = vmov 2102212464  }
  0x4d   :  { %2074 = vmatmul.mubr.f32.gmra.mrb[2].mxu0 %v46_v30  ;;  %2086 = vmatmul.mubr.f32.gmra.mrb[2].mxu1 %v54_v31  ;;  %v2363_v30 = vmov 920167782  }
  0x4e   :  { %2076 = vmatprep.mubr.f32.mxu0 %v47_v32  ;;  %2088 = vmatprep.mubr.f32.mxu1 %v55_v33 }
  0x51   :  { %2077 = vmatmul.mubr.f32.gmra.mrb[4].mxu0 %v48_v34  ;;  %2089 = vmatmul.mubr.f32.gmra.mrb[4].mxu1 %v56_v35 }
  0x52   :  { %2079 = vmatprep.mubr.f32.mxu0 %v49_v36  ;;  %2091 = vmatprep.mubr.f32.mxu1 %v57_v37  ;;  %v2364_v37 = vmov 1326507024  }
  0x55   :  { %2080 = vmatmul.mubr.f32.gmra.mrb[6].mxu0 %v50_v38  ;;  %2092 = vmatmul.mubr.f32.gmra.mrb[6].mxu1 %v58_v39 }
 0x11c   :  { %v2072_v41 = vpop.f32.mrb[0].mxu0  ;;  %v2084_v42 = vpop.f32.mrb[0].mxu1 }
 0x11d   :  { %v154_v43 = vadd.f32 %v2072_v41, %v2419_v40  ;;  %v194_v44 = vadd.f32 %v2084_v42, %v2419_v40  ;;  %v148_v45 = vpop.f32.mrb[1].mxu0  ;;  %v188_v46 = vpop.f32.mrb[1].mxu1 }
 0x11e   :  { %v149_v47 = vadd.f32 %v2419_v40, %v148_v45  ;;  %v189_v4 = vadd.f32 %v2419_v40, %v188_v46 }
 0x11f   :  { %v2424_v48 = vmul.f32 30.0, %v154_v43  ;;  %v2426_v49 = vmul.f32 30.0, %v194_v44 }
 0x120   :  { %v2428_v50 = vmul.f32 30.0, %v149_v47  ;;  %v2430_v51 = vpop.f32.mrb[2].mxu0  ;;  %v2432_v52 = vpop.f32.mrb[2].mxu1  ;;  %v2449_v14 = vmul.f32 30.0, %v189_v4 }
 0x121   :  { %v347_v53 = vand.u32 2147483647, %v2424_v48  ;;  %v350_v54 = vand.u32 2139095040, %v2424_v48  ;;  %v2436_v55 = vpop.f32.mrb[3].mxu0  ;;  %v1179_v56 = vand.u32 2147483647, %v2426_v49 }
 0x122   :  { %v1182_v57 = vand.u32 2139095040, %v2426_v49  ;;  %v246_v62 = vand.u32 2139095040, %v2428_v50  ;;  %v243_v7 = vand.u32 2147483647, %v2428_v50  ;;  %v2447_v9 = vpop.f32.mrb[3].mxu1  ;;  %vm349_vm13 = vcmp.lt.s32.totalorder %v2424_v48, 0 }
 0x123   :  { %v351_v58 = vshrl.u32 %v350_v54, 23  ;;  %v354_v59 = vand.u32 8388607, %v347_v53  ;;  %v1186_v61 = vand.u32 8388607, %v1179_v56 }
 0x124   :  { %v1183_v60 = vshrl.u32 %v1182_v57, 23  ;;  %v247_v1 = vshrl.u32 %v246_v62, 23  ;;  %v2457_v17 = vand.u32 8388607, %v243_v7  ;;  %vm2536_vm12 = vcmp.le.f32.partialorder %v347_v53, 0.7853982 }
 0x125   :  { %v1946_v63 = vadd.s32 4294967169, %v351_v58  ;;  %v355_v2 = vor.u32 8388608, %v354_v59  ;;  %v1187_v5 = vor.u32 8388608, %v1186_v61 }
 0x126   :  { %v1978_v0 = vadd.s32 4294967169, %v1183_v60  ;;  %v1942_v8 = vadd.s32 4294967169, %v247_v1 }
 0x127   :  { %v357_v3 = vadd.s32 1, %v1946_v63  ;;  %v2451_v15 = vshll.u32 %v355_v2, 8  ;;  %v2453_v16 = vshll.u32 %v1187_v5, 8 }
 0x128   :  { %v1189_v6 = vadd.s32 1, %v1978_v0  ;;  %v2459_v18 = vadd.s32 1, %v1942_v8 }
 0x129   :  { %vm358_vm0 = vcmp.gt.s32.totalorder %v357_v3, 0 }
 0x12a   :  { %v359_v10 = vsel %vm358_vm0, %v357_v3, 0  ;;  %vm1190_vm1 = vcmp.gt.s32.totalorder %v1189_v6, 0  ;;  %vm254_vm6 = vcmp.gt.s32.totalorder %v2459_v18, 0 }
 0x12b   :  { %v360_v11 = vshrl.u32 %v359_v10, 5  ;;  %v361_v12 = vand.u32 31, %v359_v10  ;;  %v1191_v13 = vsel %vm1190_vm1, %v1189_v6, 0 }
 0x12c   :  { %v2462_v22 = vshrl.u32 %v1191_v13, 5  ;;  %v1193_v23 = vand.u32 31, %v1191_v13 }
 0x12d   :  { %v362_v19 = vsub.s32 32, %v361_v12  ;;  %v364_v21 = vshll.u32 %v2359_v20, %v361_v12  ;;  %v367_v25 = vshll.u32 %v2360_v24, %v361_v12  ;;  %v370_v27 = vshll.u32 %v2361_v26, %v361_v12 }
 0x12e   :  { %v373_v29 = vshll.u32 %v2362_v28, %v361_v12  ;;  %v376_v31 = vshll.u32 %v2363_v30, %v361_v12  ;;  %vm379_vm2 = vcmp.lt.s32.totalorder %v360_v11, 1  ;;  %vm380_vm3 = vcmp.lt.s32.totalorder %v360_v11, 2 }
 0x12f   :  { %v365_v32 = vshrl.u32 %v2360_v24, %v362_v19  ;;  %v368_v33 = vshrl.u32 %v2361_v26, %v362_v19  ;;  %v371_v34 = vshrl.u32 %v2362_v28, %v362_v19  ;;  %v363_v35 = vshrl.u32 %v2359_v20, %v362_v19 }
 0x130   :  { %v374_v36 = vshrl.u32 %v2363_v30, %v362_v19  ;;  %v377_v38 = vshrl.u32 %v2364_v37, %v362_v19  ;;  %v1194_v43 = vsub.s32 32, %v1193_v23  ;;  %vm381_vm4 = vcmp.lt.s32.totalorder %v360_v11, 3 }
 0x131   :  { %v366_v39 = vor.u32 %v365_v32, %v364_v21  ;;  %v369_v41 = vor.u32 %v368_v33, %v367_v25  ;;  %v372_v42 = vor.u32 %v371_v34, %v370_v27  ;;  %vm382_vm5 = vcmp.lt.s32.totalorder %v360_v11, 4 }
 0x132   :  { %v375_v44 = vor.u32 %v374_v36, %v373_v29  ;;  %v378_v45 = vor.u32 %v377_v38, %v376_v31  ;;  %v1196_v61 = vshll.u32 %v2359_v20, %v1193_v23  ;;  %v1197_v0 = vshrl.u32 %v2360_v24, %v1194_v43 }
 0x133   :  { %v383_v46 = vsel %vm379_vm2, %v363_v35, %v366_v39  ;;  %v384_v47 = vsel %vm382_vm5, %v372_v42, 2102212464  ;;  %v387_v54 = vsel %vm379_vm2, %v366_v39, %v369_v41  ;;  %v391_v57 = vsel %vm379_vm2, %v369_v41, %v372_v42 }
 0x134   :  { %v385_v58 = vsel %vm381_vm4, %v369_v41, %v384_v47  ;;  %v388_v59 = vsel %vm382_vm5, %v375_v44, 920167782  ;;  %v392_v60 = vsel %vm382_vm5, %v378_v45, 1326507024  ;;  %v1199_v1 = vshll.u32 %v2360_v24, %v1193_v23 }
 0x135   :  { %v389_v62 = vsel %vm381_vm4, %v372_v42, %v388_v59  ;;  %v393_v63 = vsel %vm381_vm4, %v375_v44, %v392_v60  ;;  %v386_v2 = vsel %vm380_vm3, %v383_v46, %v385_v58  ;;  %v1200_v5 = vshrl.u32 %v2361_v26, %v1194_v43 }
 0x136   :  { %v390_v3 = vsel %vm380_vm3, %v387_v54, %v389_v62  ;;  %v394_v4 = vsel %vm380_vm3, %v391_v57, %v393_v63  ;;  %v1198_v13 = vor.u32 %v1197_v0, %v1196_v61  ;;  %v1202_v21 = vshll.u32 %v2361_v26, %v1193_v23 }
 0x137   :  { %v2486_v6 = vmul.u32.u64.low %v2451_v15, %v394_v4  ;;  %v2487_v8 = vmul.u32.u64.high %v2451_v15, %v394_v4, %v2486_v6  ;;  %v2490_v10 = vmul.u32.u64.low %v2451_v15, %v390_v3  ;;  %v2491_v12 = vmul.u32.u64.high %v2451_v15, %v390_v3, %v2490_v10 }
 0x138   :  { %v1201_v19 = vor.u32 %v1200_v5, %v1199_v1  ;;  %v1203_v25 = vshrl.u32 %v2362_v28, %v1194_v43  ;;  %v1195_v11 = vshrl.u32 %v2359_v20, %v1194_v43  ;;  %v1205_v27 = vshll.u32 %v2362_v28, %v1193_v23  ;;  %v2526_v1 = vpop.f32.mrb[4].mxu0 }
 0x139   :  { %v1206_v29 = vshrl.u32 %v2363_v30, %v1194_v43  ;;  %v1209_v31 = vshrl.u32 %v2364_v37, %v1194_v43  ;;  %v402_v32 = vmul.u32 %v2451_v15, %v386_v2  ;;  %v1208_v34 = vshll.u32 %v2363_v30, %v1193_v23 }
 0x13a   :  { %v1204_v33 = vor.u32 %v1203_v25, %v1202_v21  ;;  %vm1211_vm7 = vcmp.lt.s32.totalorder %v2462_v22, 1  ;;  %vm404_vm8 = vc.u32 %v2487_v8, %v2490_v10  ;;  %v405_v35 = vadd.s32 1, %v2491_v12 }
 0x13b   :  { %v1207_v36 = vor.u32 %v1206_v29, %v1205_v27  ;;  %vm1212_vm9 = vcmp.lt.s32.totalorder %v2462_v22, 2  ;;  %v1210_v38 = vor.u32 %v1209_v31, %v1208_v34  ;;  %vm1213_vm10 = vcmp.lt.s32.totalorder %v2462_v22, 3 }
 0x13c   :  { %vm1214_vm11 = vcmp.lt.s32.totalorder %v2462_v22, 4  ;;  %v1219_v39 = vsel %vm1211_vm7, %v1198_v13, %v1201_v19  ;;  %v406_v15 = vsel %vm404_vm8, %v405_v35, %v2491_v12  ;;  %v1223_v42 = vsel %vm1211_vm7, %v1201_v19, %v1204_v33 }
 0x13d   :  { %v1216_v41 = vsel %vm1214_vm11, %v1204_v33, 2102212464  ;;  %v1220_v23 = vsel %vm1214_vm11, %v1207_v36, 920167782  ;;  %v407_v43 = vadd.s32 %v406_v15, %v402_v32  ;;  %v1215_v44 = vsel %vm1211_vm7, %v1195_v11, %v1198_v13 }
 0x13e   :  { %v1221_v45 = vsel %vm1213_vm10, %v1204_v33, %v1220_v23  ;;  %v1224_v46 = vsel %vm1214_vm11, %v1210_v38, 1326507024  ;;  %v1217_v47 = vsel %vm1213_vm10, %v1201_v19, %v1216_v41  ;;  %v255_v58 = vsel %vm254_vm6, %v2459_v18, 0 }
 0x13f   :  { %v1222_v54 = vsel %vm1212_vm9, %v1219_v39, %v1221_v45  ;;  %v1225_v57 = vsel %vm1213_vm10, %v1207_v36, %v1224_v46  ;;  %v408_v59 = vadd.s32 536870912, %v407_v43  ;;  %v1218_v3 = vsel %vm1212_vm9, %v1215_v44, %v1217_v47 }
 0x140   :  { %v1226_v60 = vsel %vm1212_vm9, %v1223_v42, %v1225_v57  ;;  %v2518_v61 = vmul.u32.u64.low %v2453_v16, %v1222_v54  ;;  %v2519_v62 = vmul.u32.u64.high %v2453_v16, %v1222_v54, %v2518_v61  ;;  %v257_v18 = vand.u32 31, %v255_v58 }
 0x141   :  { %v2523_v63 = vmul.u32.u64.low %v2453_v16, %v1226_v60  ;;  %v2524_v0 = vmul.u32.u64.high %v2453_v16, %v1226_v60, %v2523_v63  ;;  %v409_v2 = vshrl.u32 %v408_v59, 30  ;;  %v1075_v4 = vand.u32 2147483647, %v2449_v14 }
 0x142   :  { %v251_v5 = vor.u32 8388608, %v2457_v17  ;;  %v1078_v6 = vand.u32 2139095040, %v2449_v14  ;;  %v1237_v13 = vadd.s32 1, %v2519_v62  ;;  %v258_v19 = vsub.s32 32, %v257_v18 }
 0x143   :  { %v410_v12 = vshll.u32 %v409_v2, 30  ;;  %v1234_v22 = vmul.u32 %v2453_v16, %v1218_v3  ;;  %vm1236_vm14 = vc.u32 %v2524_v0, %v2518_v61  ;;  %v433_v25 = vsub.s32 4, %v409_v2 }
 0x144   :  { %v1238_v11 = vsel %vm1236_vm14, %v1237_v13, %v2519_v62  ;;  %v2549_v27 = vand.u32 8388607, %v1075_v4  ;;  %v261_v29 = vshrl.u32 %v2360_v24, %v258_v19  ;;  %v2552_v31 = vshll.u32 %v251_v5, 8 }
 0x145   :  { %v2544_v17 = vsub.s32 %v407_v43, %v410_v12  ;;  %v1239_v53 = vadd.s32 %v1238_v11, %v1234_v22  ;;  %v1079_v32 = vshrl.u32 %v1078_v6, 23  ;;  %v403_v16 = vadd.s32 %v2490_v10, %v2487_v8 }
 0x146   :  { %v264_v34 = vshrl.u32 %v2361_v26, %v258_v19  ;;  %v267_v35 = vshrl.u32 %v2362_v28, %v258_v19  ;;  %v2559_v38 = vshrl.u32 %v255_v58, 5  ;;  %v260_v39 = vshll.u32 %v2359_v20, %v257_v18 }
 0x147   :  { %v413_v33 = vsub.s32 0, %v2544_v17  ;;  %v1240_v36 = vadd.s32 536870912, %v1239_v53  ;;  %v263_v15 = vshll.u32 %v2360_v24, %v257_v18  ;;  %v434_v23 = vsel %vm349_vm13, %v433_v25, %v409_v2 }
 0x148   :  { %v266_v8 = vshll.u32 %v2361_v26, %v257_v18  ;;  %v270_v10 = vshrl.u32 %v2363_v30, %v258_v19  ;;  %v262_v43 = vor.u32 %v261_v29, %v260_v39  ;;  %v269_v44 = vshll.u32 %v2362_v28, %v257_v18 }
 0x149   :  { %v1947_v41 = vmin.u32 %v413_v33, %v2544_v17  ;;  %v2568_v42 = vshrl.u32 %v1240_v36, 30  ;;  %v273_v45 = vshrl.u32 %v2364_v37, %v258_v19  ;;  %v265_v47 = vor.u32 %v264_v34, %v263_v15 }
 0x14a   :  { %v268_v54 = vor.u32 %v267_v35, %v266_v8  ;;  %v272_v57 = vshll.u32 %v2363_v30, %v257_v18  ;;  %v271_v59 = vor.u32 %v270_v10, %v269_v44  ;;  %vm275_vm15 = vcmp.lt.s32.totalorder %v2559_v38, 1 }
 0x14b   :  { %v415_v46 = vclz %v1947_v41  ;;  %v1242_v58 = vshll.u32 %v2568_v42, 30  ;;  %v1974_v60 = vadd.s32 4294967169, %v1079_v32  ;;  %v436_v63 = vsel %vm2536_vm12, 0, %v434_v23 }
 0x14c   :  { %v274_v2 = vor.u32 %v273_v45, %v272_v57  ;;  %vm278_vm0 = vcmp.lt.s32.totalorder %v2559_v38, 4  ;;  %vm276_vm1 = vcmp.lt.s32.totalorder %v2559_v38, 2  ;;  %vm277_vm2 = vcmp.lt.s32.totalorder %v2559_v38, 3 }
 0x14d   :  { %v1948_v62 = vadd.s32 4294967294, %v415_v46  ;;  %v2578_v3 = vsub.s32 %v1239_v53, %v1242_v58  ;;  %v284_v18 = vsel %vm278_vm0, %v271_v59, 920167782  ;;  %v259_v5 = vshrl.u32 %v2359_v20, %v258_v19 }
 0x14e   :  { %v283_v6 = vsel %vm275_vm15, %v262_v43, %v265_v47  ;;  %v285_v12 = vsel %vm277_vm2, %v268_v54, %v284_v18  ;;  %v440_v22 = vadd.s32 3, %v436_v63  ;;  %v287_v11 = vsel %vm275_vm15, %v265_v47, %v268_v54  ;;  %v2622_v63 = vpop.f32.mrb[4].mxu1 }
 0x14f   :  { %vm1949_vm3 = vcmp.lt.s32.totalorder %v1948_v62, 0  ;;  %v1245_v25 = vsub.s32 0, %v2578_v3  ;;  %vm1181_vm4 = vcmp.lt.s32.totalorder %v2426_v49, 0  ;;  %v280_v19 = vsel %vm278_vm0, %v268_v54, 2102212464 }
 0x150   :  { %v418_v13 = vsel %vm1949_vm3, 0, %v1948_v62  ;;  %v288_v32 = vsel %vm278_vm0, %v274_v2, 1326507024  ;;  %v286_v35 = vsel %vm276_vm1, %v283_v6, %v285_v12  ;;  %v1085_v23 = vadd.s32 1, %v1974_v60 }
 0x151   :  { %v419_v53 = vsub.s32 32, %v418_v13  ;;  %v423_v29 = vsub.s32 4294967266, %v418_v13  ;;  %v420_v33 = vshll.u32 %v2544_v17, %v418_v13  ;;  %v1979_v34 = vmin.u32 %v1245_v25, %v2578_v3 }
 0x152   :  { %v289_v36 = vsel %vm277_vm2, %v271_v59, %v288_v32  ;;  %v1265_v10 = vsub.s32 4, %v2568_v42  ;;  %v279_v17 = vsel %vm275_vm15, %v259_v5, %v262_v43  ;;  %v281_v44 = vsel %vm277_vm2, %v265_v47, %v280_v19 }
 0x153   :  { %v421_v39 = vshrl.u32 %v403_v16, %v419_v53  ;;  %v424_v15 = vadd.s32 127, %v423_v29  ;;  %v290_v41 = vsel %vm276_vm1, %v287_v11, %v289_v36  ;;  %v1247_v8 = vclz %v1979_v34 }
 0x154   :  { %v2611_v54 = vmul.u32.u64.low %v2552_v31, %v290_v41  ;;  %v2612_v57 = vmul.u32.u64.high %v2552_v31, %v290_v41, %v2611_v54  ;;  %v2615_v58 = vmul.u32.u64.low %v2552_v31, %v286_v35  ;;  %v2616_v59 = vmul.u32.u64.high %v2552_v31, %v286_v35, %v2615_v58 }
 0x155   :  { %v422_v45 = vor.u32 %v421_v39, %v420_v33  ;;  %v425_v46 = vshll.u32 %v424_v15, 23  ;;  %v1980_v16 = vadd.s32 4294967294, %v1247_v8  ;;  %vm1086_vm5 = vcmp.gt.s32.totalorder %v1085_v23, 0 }
 0x156   :  { %v1235_v43 = vadd.s32 %v2518_v61, %v2524_v0  ;;  %v1083_v62 = vor.u32 8388608, %v2549_v27  ;;  %v1087_v47 = vsel %vm1086_vm5, %v1085_v23, 0  ;;  %v2624_v2 = vand.u32 3, %v440_v22 }
 0x157   :  { %v426_v60 = vor.u32 4788187, %v425_v46  ;;  %vm1981_vm6 = vcmp.lt.s32.totalorder %v1980_v16, 0  ;;  %v282_v18 = vsel %vm276_vm1, %v279_v17, %v281_v44  ;;  %v1089_v5 = vand.u32 31, %v1087_v47 }
 0x158   :  { %v429_v12 = vcvt.s32.f32 %v422_v45  ;;  %v1250_v13 = vsel %vm1981_vm6, 0, %v1980_v16  ;;  %vm300_vm7 = vc.u32 %v2612_v57, %v2615_v58  ;;  %v2633_v0 = vsel %vm1181_vm4, %v1265_v10, %v2568_v42 }
 0x159   :  { %v427_v6 = vand.u32 2147483647, %v426_v60  ;;  %v1251_v25 = vsub.s32 32, %v1250_v13  ;;  %v1255_v61 = vsub.s32 4294967266, %v1250_v13  ;;  %v301_v27 = vadd.s32 1, %v2616_v59 }
 0x15a   :  { %v298_v38 = vmul.u32 %v2552_v31, %v282_v18  ;;  %v2637_v11 = vshrl.u32 %v1087_v47, 5  ;;  %v1090_v53 = vsub.s32 32, %v1089_v5  ;;  %v1252_v29 = vshll.u32 %v2578_v3, %v1250_v13 }
 0x15b   :  { %v430_v22 = vmul.f32 %v429_v12, %v427_v6  ;;  %v1253_v19 = vshrl.u32 %v1235_v43, %v1251_v25  ;;  %v1256_v32 = vadd.s32 127, %v1255_v61  ;;  %v302_v33 = vsel %vm300_vm7, %v301_v27, %v2616_v59 }
 0x15c   :  { %v303_v35 = vadd.s32 %v302_v33, %v298_v38  ;;  %v1092_v36 = vshll.u32 %v2359_v20, %v1089_v5  ;;  %v1093_v42 = vshrl.u32 %v2360_v24, %v1090_v53  ;;  %v1095_v41 = vshll.u32 %v2360_v24, %v1089_v5 }
 0x15d   :  { %v431_v34 = vxor.u32 2147483648, %v430_v22  ;;  %v1254_v39 = vor.u32 %v1253_v19, %v1252_v29  ;;  %v1257_v15 = vshll.u32 %v1256_v32, 23  ;;  %v1096_v31 = vshrl.u32 %v2361_v26, %v1090_v53 }
 0x15e   :  { %v304_v3 = vadd.s32 536870912, %v303_v35  ;;  %v1098_v8 = vshll.u32 %v2361_v26, %v1089_v5  ;;  %v1099_v10 = vshrl.u32 %v2362_v28, %v1090_v53  ;;  %v1094_v45 = vor.u32 %v1093_v42, %v1092_v36 }
 0x15f   :  { %v432_v23 = vsel %vm349_vm13, %v431_v34, %v430_v22  ;;  %v1258_v44 = vor.u32 4788187, %v1257_v15  ;;  %v1101_v46 = vshll.u32 %v2362_v28, %v1089_v5  ;;  %v1261_v54 = vcvt.s32.f32 %v1254_v39 }
 0x160   :  { %v435_v17 = vsel %vm2536_vm12, %v2424_v48, %v432_v23  ;;  %v2653_v16 = vshrl.u32 %v304_v3, 30  ;;  %v1102_v59 = vshrl.u32 %v2363_v30, %v1090_v53  ;;  %v1097_v43 = vor.u32 %v1096_v31, %v1095_v41 }
 0x161   :  { %2217 = vcosq.f32 %v435_v17  ;;  %v1259_v60 = vand.u32 2147483647, %v1258_v44  ;;  %v1105_v47 = vshrl.u32 %v2364_v37, %v1090_v53  ;;  %vm2660_vm8 = vcmp.le.f32.partialorder %v1179_v56, 0.7853982 }
 0x162   :  { %2219 = vsinq.f32 %v435_v17  ;;  %v306_v18 = vshll.u32 %v2653_v16, 30  ;;  %v1103_v6 = vor.u32 %v1102_v59, %v1101_v46  ;;  %v1100_v13 = vor.u32 %v1099_v10, %v1098_v8 }
 0x163   :  { %v1262_v12 = vmul.f32 %v1261_v54, %v1259_v60  ;;  %v1104_v25 = vshll.u32 %v2363_v30, %v1089_v5  ;;  %vm446_vm9 = vcmp.eq.s32.totalorder %v2624_v2, 2  ;;  %v1268_v61 = vsel %vm2660_vm8, 0, %v2633_v0 }
 0x164   :  { %v2669_v27 = vsub.s32 %v303_v35, %v306_v18  ;;  %vm1107_vm10 = vcmp.lt.s32.totalorder %v2637_v11, 1  ;;  %v2672_v22 = vshll.u32 %v1083_v62, 8  ;;  %vm443_vm11 = vcmp.eq.s32.totalorder %v2624_v2, 0 }
 0x165   :  { %v1263_v56 = vxor.u32 2147483648, %v1262_v12  ;;  %v1106_v38 = vor.u32 %v1105_v47, %v1104_v25  ;;  %vm1110_vm12 = vcmp.lt.s32.totalorder %v2637_v11, 4  ;;  %v1115_v5 = vsel %vm1107_vm10, %v1094_v45, %v1097_v43 }
 0x166   :  { %vm442_vm13 = vcmp.lt.s32.totalorder %v2624_v2, 2  ;;  %v309_v29 = vsub.s32 0, %v2669_v27  ;;  %v1091_v0 = vshrl.u32 %v2359_v20, %v1090_v53  ;;  %vm1109_vm14 = vcmp.lt.s32.totalorder %v2637_v11, 3 }
 0x167   :  { %v1116_v62 = vsel %vm1110_vm12, %v1103_v6, 920167782  ;;  %vm439_vm15 = vweird.f32 %v2424_v48  ;;  %v1264_v19 = vsel %vm1181_vm4, %v1263_v56, %v1262_v12  ;;  %vm245_vm0 = vcmp.lt.s32.totalorder %v2428_v50, 0  ;;  %v2727_v12 = vpop.f32.mrb[5].mxu0 }
 0x168   :  { %vm1108_vm1 = vcmp.lt.s32.totalorder %v2637_v11, 2  ;;  %v1112_v32 = vsel %vm1110_vm12, %v1100_v13, 2102212464  ;;  %v1117_v53 = vsel %vm1109_vm14, %v1100_v13, %v1116_v62  ;;  %v1267_v33 = vsel %vm2660_vm8, %v2426_v49, %v1264_v19 }
 0x169   :  { %v1943_v34 = vmin.u32 %v309_v29, %v2669_v27  ;;  %v1118_v35 = vsel %vm1108_vm1, %v1115_v5, %v1117_v53  ;;  %v1119_v36 = vsel %vm1107_vm10, %v1097_v43, %v1100_v13  ;;  %2221 = vcosq.f32 %v1267_v33 }
 0x16a   :  { %v1120_v42 = vsel %vm1110_vm12, %v1106_v38, 1326507024  ;;  %v2704_v39 = vmul.u32.u64.low %v2672_v22, %v1118_v35  ;;  %v2705_v15 = vmul.u32.u64.high %v2672_v22, %v1118_v35, %v2704_v39  ;;  %2223 = vsinq.f32 %v1267_v33 }
 0x16b   :  { %v2218_v41 = vpop.eup %2217  ;;  %v311_v31 = vclz %v1943_v34  ;;  %v1111_v23 = vsel %vm1107_vm10, %v1091_v0, %v1094_v45  ;;  %v1113_v3 = vsel %vm1109_vm14, %v1097_v43, %v1112_v32  ;;  %v1272_v17 = vadd.s32 3, %v1268_v61 }
 0x16c   :  { %v2220_v8 = vpop.eup %2219  ;;  %v447_v10 = vxor.u32 2147483648, %v2218_v41  ;;  %v329_v44 = vsub.s32 4, %v2653_v16  ;;  %v1121_v46 = vsel %vm1109_vm14, %v1103_v6, %v1120_v42  ;;  %v164_v47 = vadd.f32 %v2430_v51, %v2419_v40 }
 0x16d   :  { %v444_v54 = vxor.u32 2147483648, %v2220_v8  ;;  %v1944_v59 = vadd.s32 4294967294, %v311_v31  ;;  %v1122_v60 = vsel %vm1108_vm1, %v1119_v36, %v1121_v46  ;;  %v1114_v43 = vsel %vm1108_vm1, %v1111_v23, %v1113_v3 }
 0x16e   :  { %v448_v45 = vsel %vm446_vm9, %v447_v10, %v2220_v8  ;;  %v2724_v18 = vmul.u32.u64.low %v2672_v22, %v1122_v60  ;;  %v2725_v21 = vmul.u32.u64.high %v2672_v22, %v1122_v60, %v2724_v18  ;;  %v1133_v13 = vadd.s32 1, %v2705_v15 }
 0x16f   :  { %v445_v6 = vsel %vm443_vm11, %v2218_v41, %v444_v54  ;;  %vm1945_vm2 = vcmp.lt.s32.totalorder %v1944_v59, 0  ;;  %v2732_v25 = vmul.f32 30.0, %v164_v47  ;;  %v1273_v61 = vand.u32 3, %v1272_v17 }
 0x170   :  { %v449_v51 = vsel %vm442_vm13, %v445_v6, %v448_v45  ;;  %v299_v11 = vadd.s32 %v2615_v58, %v2612_v57  ;;  %v314_v56 = vsel %vm1945_vm2, 0, %v1944_v59  ;;  %vm1271_vm3 = vweird.f32 %v2426_v49 }
 0x171   :  { %v450_v38 = vsel %vm439_vm15, nan, %v449_v51  ;;  %v315_v5 = vsub.s32 32, %v314_v56  ;;  %v319_v29 = vsub.s32 4294967266, %v314_v56  ;;  %v330_v0 = vsel %vm245_vm0, %v329_v44, %v2653_v16 }
 0x172   :  { %1908 = vst [vmem:[#allocation7 + $0x8] sm:$0xff] %v450_v38  ;;  %v316_v2 = vshll.u32 %v2669_v27, %v314_v56  ;;  %v1130_v62 = vmul.u32 %v2672_v22, %v1114_v43  ;;  %vm1132_vm4 = vc.u32 %v2725_v21, %v2704_v39  ;;  %v555_v57 = vand.u32 2147483647, %v2732_v25 }
 0x173   :  { %v317_v48 = vshrl.u32 %v299_v11, %v315_v5  ;;  %v320_v58 = vadd.s32 127, %v319_v29  ;;  %v1134_v19 = vsel %vm1132_vm4, %v1133_v13, %v2705_v15  ;;  %v558_v32 = vand.u32 2139095040, %v2732_v25  ;;  %v2222_v53 = vpop.eup %2221 }
 0x174   :  { %vm1275_vm5 = vcmp.eq.s32.totalorder %v1273_v61, 0  ;;  %vm2753_vm6 = vcmp.le.f32.partialorder %v243_v7, 0.7853982  ;;  %v1135_v27 = vadd.s32 %v1134_v19, %v1130_v62  ;;  %v204_v22 = vadd.f32 %v2432_v52, %v2419_v40  ;;  %v2224_v33 = vpop.eup %2223 }
 0x175   :  { %v1279_v34 = vxor.u32 2147483648, %v2222_v53  ;;  %v318_v35 = vor.u32 %v317_v48, %v316_v2  ;;  %v321_v36 = vshll.u32 %v320_v58, 23  ;;  %v559_v42 = vshrl.u32 %v558_v32, 23 }
 0x176   :  { %v1276_v15 = vxor.u32 2147483648, %v2224_v33  ;;  %vm1278_vm7 = vcmp.eq.s32.totalorder %v1273_v61, 2  ;;  %v332_v41 = vsel %vm2753_vm6, 0, %v330_v0  ;;  %v1136_v31 = vadd.s32 536870912, %v1135_v27 }
 0x177   :  { %v1280_v23 = vsel %vm1278_vm7, %v1279_v34, %v2224_v33  ;;  %v322_v7 = vor.u32 4788187, %v321_v36  ;;  %v1954_v3 = vadd.s32 4294967169, %v559_v42  ;;  %v562_v8 = vand.u32 8388607, %v555_v57 }
 0x178   :  { %vm1274_vm8 = vcmp.lt.s32.totalorder %v1273_v61, 2  ;;  %v1277_v52 = vsel %vm1275_vm5, %v2222_v53, %v1276_v15  ;;  %v1137_v10 = vshrl.u32 %v1136_v31, 30  ;;  %v2764_v17 = vmul.f32 30.0, %v204_v22 }
 0x179   :  { %v1281_v44 = vsel %vm1274_vm8, %v1277_v52, %v1280_v23  ;;  %v323_v46 = vand.u32 2147483647, %v322_v7  ;;  %v325_v54 = vcvt.s32.f32 %v318_v35  ;;  %v565_v59 = vadd.s32 1, %v1954_v3 }
 0x17a   :  { %v1282_v60 = vsel %vm1271_vm3, nan, %v1281_v44  ;;  %v336_v47 = vadd.s32 3, %v332_v41  ;;  %v1138_v45 = vshll.u32 %v1137_v10, 30  ;;  %v1161_v43 = vsub.s32 4, %v1137_v10 }
 0x17b   :  { %1916 = vst [vmem:[#allocation7 + $0x48] sm:$0xff] %v1282_v60  ;;  %v326_v18 = vmul.f32 %v325_v54, %v323_v46  ;;  %vm1077_vm9 = vcmp.lt.s32.totalorder %v2449_v14, 0  ;;  %v563_v6 = vor.u32 8388608, %v562_v8  ;;  %vm566_vm10 = vcmp.gt.s32.totalorder %v565_v59, 0 }
 0x17c   :  { %v2769_v13 = vsub.s32 %v1135_v27, %v1138_v45  ;;  %v1162_v51 = vsel %vm1077_vm9, %v1161_v43, %v1137_v10  ;;  %v567_v61 = vsel %vm566_vm10, %v565_v59, 0  ;;  %v1387_v11 = vand.u32 2147483647, %v2764_v17 }
 0x17d   :  { %v327_v56 = vxor.u32 2147483648, %v326_v18  ;;  %vm2776_vm11 = vcmp.le.f32.partialorder %v1075_v4, 0.7853982  ;;  %v569_v38 = vand.u32 31, %v567_v61  ;;  %v2780_v5 = vand.u32 3, %v336_v47 }
 0x17e   :  { %v1141_v29 = vsub.s32 0, %v2769_v13  ;;  %v1164_v0 = vsel %vm2776_vm11, 0, %v1162_v51  ;;  %v1390_v2 = vand.u32 2139095040, %v2764_v17  ;;  %v1131_v48 = vadd.s32 %v2704_v39, %v2725_v21 }
 0x17f   :  { %v328_v62 = vsel %vm245_vm0, %v327_v56, %v326_v18  ;;  %v570_v4 = vsub.s32 32, %v569_v38  ;;  %v2790_v58 = vshll.u32 %v563_v6, 8  ;;  %v2796_v53 = vshrl.u32 %v567_v61, 5 }
 0x180   :  { %v331_v19 = vsel %vm2753_vm6, %v2428_v50, %v328_v62  ;;  %v1975_v32 = vmin.u32 %v1141_v29, %v2769_v13  ;;  %v2800_v27 = vand.u32 8388607, %v1387_v11  ;;  %v2802_v22 = vadd.s32 3, %v1164_v0 }
 0x181   :  { %2225 = vcosq.f32 %v331_v19  ;;  %v573_v39 = vshrl.u32 %v2360_v24, %v570_v4  ;;  %v576_v21 = vshrl.u32 %v2361_v26, %v570_v4  ;;  %v572_v16 = vshll.u32 %v2359_v20, %v569_v38 }
 0x182   :  { %2227 = vsinq.f32 %v331_v19  ;;  %v1143_v33 = vclz %v1975_v32  ;;  %v1391_v34 = vshrl.u32 %v1390_v2, 23  ;;  %v571_v35 = vshrl.u32 %v2359_v20, %v570_v4 }
 0x183   :  { %v575_v36 = vshll.u32 %v2360_v24, %v569_v38  ;;  %v578_v42 = vshll.u32 %v2361_v26, %v569_v38  ;;  %v579_v15 = vshrl.u32 %v2362_v28, %v570_v4  ;;  %v574_v31 = vor.u32 %v573_v39, %v572_v16 }
 0x184   :  { %v1976_v41 = vadd.s32 4294967294, %v1143_v33  ;;  %v581_v23 = vshll.u32 %v2362_v28, %v569_v38  ;;  %v582_v7 = vshrl.u32 %v2363_v30, %v570_v4  ;;  %vm342_vm12 = vcmp.eq.s32.totalorder %v2780_v5, 2  ;;  %v2834_v33 = vpop.f32.mrb[5].mxu1 }
 0x185   :  { %v577_v3 = vor.u32 %v576_v21, %v575_v36  ;;  %v580_v8 = vor.u32 %v579_v15, %v578_v42  ;;  %v584_v52 = vshll.u32 %v2363_v30, %v569_v38  ;;  %v585_v10 = vshrl.u32 %v2364_v37, %v570_v4 }
 0x186   :  { %vm339_vm13 = vcmp.eq.s32.totalorder %v2780_v5, 0  ;;  %vm1977_vm14 = vcmp.lt.s32.totalorder %v1976_v41, 0  ;;  %v583_v44 = vor.u32 %v582_v7, %v581_v23  ;;  %vm587_vm15 = vcmp.lt.s32.totalorder %v2796_v53, 1 }
 0x187   :  { %vm588_vm0 = vcmp.lt.s32.totalorder %v2796_v53, 2  ;;  %vm338_vm1 = vcmp.lt.s32.totalorder %v2780_v5, 2  ;;  %v1146_v46 = vsel %vm1977_vm14, 0, %v1976_v41  ;;  %v586_v54 = vor.u32 %v585_v10, %v584_v52 }
 0x188   :  { %vm589_vm2 = vcmp.lt.s32.totalorder %v2796_v53, 3  ;;  %vm590_vm3 = vcmp.lt.s32.totalorder %v2796_v53, 4  ;;  %vm335_vm4 = vweird.f32 %v2428_v50  ;;  %v1147_v59 = vsub.s32 32, %v1146_v46 }
 0x189   :  { %v1151_v60 = vsub.s32 4294967266, %v1146_v46  ;;  %v591_v47 = vsel %vm587_vm15, %v571_v35, %v574_v31  ;;  %v592_v45 = vsel %vm590_vm3, %v580_v8, 2102212464  ;;  %v1148_v43 = vshll.u32 %v2769_v13, %v1146_v46 }
 0x18a   :  { %v595_v18 = vsel %vm587_vm15, %v574_v31, %v577_v3  ;;  %v596_v6 = vsel %vm590_vm3, %v583_v44, 920167782  ;;  %v599_v51 = vsel %vm587_vm15, %v577_v3, %v580_v8  ;;  %v1149_v61 = vshrl.u32 %v1131_v48, %v1147_v59 }
 0x18b   :  { %v1152_v56 = vadd.s32 127, %v1151_v60  ;;  %v597_v38 = vsel %vm589_vm2, %v580_v8, %v596_v6  ;;  %v600_v29 = vsel %vm590_vm3, %v586_v54, 1326507024  ;;  %v2226_v0 = vpop.eup %2225  ;;  %v593_v2 = vsel %vm589_vm2, %v577_v3, %v592_v45 }
 0x18c   :  { %v598_v62 = vsel %vm588_vm0, %v595_v18, %v597_v38  ;;  %v601_v4 = vsel %vm589_vm2, %v583_v44, %v600_v29  ;;  %v1986_v13 = vadd.s32 4294967169, %v1391_v34  ;;  %v2228_v19 = vpop.eup %2227  ;;  %v343_v32 = vxor.u32 2147483648, %v2226_v0 }
 0x18d   :  { %v1150_v39 = vor.u32 %v1149_v61, %v1148_v43  ;;  %v1153_v48 = vshll.u32 %v1152_v56, 23  ;;  %v602_v21 = vsel %vm588_vm0, %v599_v51, %v601_v4  ;;  %v340_v16 = vxor.u32 2147483648, %v2228_v19 }
 0x18e   :  { %v2837_v35 = vmul.u32.u64.low %v2790_v58, %v602_v21  ;;  %v2838_v36 = vmul.u32.u64.high %v2790_v58, %v602_v21, %v2837_v35  ;;  %v1397_v42 = vadd.s32 1, %v1986_v13  ;;  %v344_v15 = vsel %vm342_vm12, %v343_v32, %v2228_v19 }
 0x18f   :  { %v1154_v41 = vor.u32 4788187, %v1153_v48  ;;  %v594_v34 = vsel %vm588_vm0, %v591_v47, %v593_v2  ;;  %v1395_v31 = vor.u32 8388608, %v2800_v27  ;;  %v341_v23 = vsel %vm339_vm13, %v2226_v0, %v340_v16 }
 0x190   :  { %v2848_v7 = vmul.u32.u64.low %v2790_v58, %v598_v62  ;;  %v2849_v3 = vmul.u32.u64.high %v2790_v58, %v598_v62, %v2848_v7  ;;  %vm1398_vm5 = vcmp.gt.s32.totalorder %v1397_v42, 0  ;;  %v345_v8 = vsel %vm338_vm1, %v341_v23, %v344_v15 }
 0x191   :  { %v1155_v52 = vand.u32 2147483647, %v1154_v41  ;;  %v1157_v10 = vcvt.s32.f32 %v1150_v39  ;;  %v1399_v44 = vsel %vm1398_vm5, %v1397_v42, 0  ;;  %v346_v53 = vsel %vm335_vm4, nan, %v345_v8 }
 0x192   :  { %v2856_v46 = vshrl.u32 %v1399_v44, 5  ;;  %1907 = vst [vmem:[#allocation7] sm:$0xff] %v346_v53  ;;  %vm612_vm6 = vc.u32 %v2838_v36, %v2848_v7  ;;  %v1401_v54 = vand.u32 31, %v1399_v44  ;;  %v159_v59 = vadd.f32 %v2419_v40, %v2436_v55 }
 0x193   :  { %v1158_v27 = vmul.f32 %v1157_v10, %v1155_v52  ;;  %v2863_v5 = vand.u32 3, %v2802_v22  ;;  %v610_v60 = vmul.u32 %v2790_v58, %v594_v34  ;;  %v613_v47 = vadd.s32 1, %v2849_v3 }
 0x194   :  { %v2867_v50 = vshll.u32 %v1395_v31, 8  ;;  %v1402_v43 = vsub.s32 32, %v1401_v54  ;;  %v1404_v18 = vshll.u32 %v2359_v20, %v1401_v54  ;;  %vm1419_vm7 = vcmp.lt.s32.totalorder %v2856_v46, 1 }
 0x195   :  { %v1159_v45 = vxor.u32 2147483648, %v1158_v27  ;;  %v614_v6 = vsel %vm612_vm6, %v613_v47, %v2849_v3  ;;  %v1407_v51 = vshll.u32 %v2360_v24, %v1401_v54  ;;  %v1410_v40 = vshll.u32 %v2361_v26, %v1401_v54 }
 0x196   :  { %v1413_v55 = vshll.u32 %v2362_v28, %v1401_v54  ;;  %v615_v22 = vadd.s32 %v614_v6, %v610_v60  ;;  %v1405_v61 = vshrl.u32 %v2360_v24, %v1402_v43  ;;  %v1416_v56 = vshll.u32 %v2363_v30, %v1401_v54 }
 0x197   :  { %v1160_v58 = vsel %vm1077_vm9, %v1159_v45, %v1158_v27  ;;  %v1408_v29 = vshrl.u32 %v2361_v26, %v1402_v43  ;;  %v1411_v0 = vshrl.u32 %v2362_v28, %v1402_v43  ;;  %v1414_v2 = vshrl.u32 %v2363_v30, %v1402_v43 }
 0x198   :  { %v1163_v38 = vsel %vm2776_vm11, %v2449_v14, %v1160_v58  ;;  %v616_v62 = vadd.s32 536870912, %v615_v22  ;;  %v1406_v4 = vor.u32 %v1405_v61, %v1404_v18  ;;  %v1417_v13 = vshrl.u32 %v2364_v37, %v1402_v43 }
 0x199   :  { %2229 = vcosq.f32 %v1163_v38  ;;  %v1409_v19 = vor.u32 %v1408_v29, %v1407_v51  ;;  %v1412_v32 = vor.u32 %v1411_v0, %v1410_v40  ;;  %v1415_v39 = vor.u32 %v1414_v2, %v1413_v55  ;;  %v2946_v2 = vpop.f32.mrb[6].mxu0 }
 0x19a   :  { %2231 = vsinq.f32 %v1163_v38  ;;  %v617_v48 = vshrl.u32 %v616_v62, 30  ;;  %v1418_v21 = vor.u32 %v1417_v13, %v1416_v56  ;;  %vm1421_vm8 = vcmp.lt.s32.totalorder %v2856_v46, 3 }
 0x19b   :  { %vm1422_vm9 = vcmp.lt.s32.totalorder %v2856_v46, 4  ;;  %v1403_v49 = vshrl.u32 %v2359_v20, %v1402_v43  ;;  %v1427_v35 = vsel %vm1419_vm7, %v1406_v4, %v1409_v19  ;;  %vm1420_vm10 = vcmp.lt.s32.totalorder %v2856_v46, 2  ;;  %v2923_v43 = vld [vmem:[%s3757_s2] ss:$0 sm:$0xff] }
 0x19c   :  { %v1424_v16 = vsel %vm1422_vm9, %v1412_v32, 2102212464  ;;  %v1428_v42 = vsel %vm1422_vm9, %v1415_v39, 920167782  ;;  %v618_v15 = vshll.u32 %v617_v48, 30  ;;  %v1431_v34 = vsel %vm1419_vm7, %v1409_v19, %v1412_v32 }
 0x19d   :  { %v1429_v41 = vsel %vm1421_vm8, %v1412_v32, %v1428_v42  ;;  %v1423_v31 = vsel %vm1419_vm7, %v1403_v49, %v1406_v4  ;;  %v1432_v3 = vsel %vm1422_vm9, %v1418_v21, 1326507024  ;;  %v2900_v8 = vmul.f32 30.0, %v159_v59 }
 0x19e   :  { %v1430_v23 = vsel %vm1420_vm10, %v1427_v35, %v1429_v41  ;;  %v2902_v52 = vsub.s32 %v615_v22, %v618_v15  ;;  %v641_v10 = vsub.s32 4, %v617_v48  ;;  %v1425_v44 = vsel %vm1421_vm8, %v1409_v19, %v1424_v16 }
 0x19f   :  { %v1433_v53 = vsel %vm1421_vm8, %v1415_v39, %v1432_v3  ;;  %v2911_v54 = vmul.u32.u64.low %v2867_v50, %v1430_v23  ;;  %v2912_v60 = vmul.u32.u64.high %v2867_v50, %v1430_v23, %v2911_v54  ;;  %v199_v18 = vadd.f32 %v2923_v43, %v2447_v9 }
 0x1a0   :  { %v1434_v27 = vsel %vm1420_vm10, %v1431_v34, %v1433_v53  ;;  %v621_v59 = vsub.s32 0, %v2902_v52  ;;  %vm557_vm11 = vcmp.lt.s32.totalorder %v2732_v25, 0  ;;  %v1426_v6 = vsel %vm1420_vm10, %v1423_v31, %v1425_v44 }
 0x1a1   :  { %v2917_v47 = vmul.u32.u64.low %v2867_v50, %v1434_v27  ;;  %v2918_v45 = vmul.u32.u64.high %v2867_v50, %v1434_v27, %v2917_v47  ;;  %v451_v51 = vand.u32 2147483647, %v2900_v8  ;;  %v454_v40 = vand.u32 2139095040, %v2900_v8 }
 0x1a2   :  { %vm1170_vm12 = vcmp.lt.s32.totalorder %v2863_v5, 2  ;;  %vm2935_vm13 = vcmp.le.f32.partialorder %v555_v57, 0.7853982  ;;  %v1955_v9 = vmin.u32 %v621_v59, %v2902_v52  ;;  %v642_v22 = vsel %vm557_vm11, %v641_v10, %v617_v48 }
 0x1a3   :  { %v2230_v55 = vpop.eup %2229  ;;  %vm1171_vm14 = vcmp.eq.s32.totalorder %v2863_v5, 0  ;;  %v1445_v56 = vadd.s32 1, %v2912_v60  ;;  %v455_v38 = vshrl.u32 %v454_v40, 23  ;;  %vm1174_vm15 = vcmp.eq.s32.totalorder %v2863_v5, 2 }
 0x1a4   :  { %v2232_v46 = vpop.eup %2231  ;;  %v1175_v61 = vxor.u32 2147483648, %v2230_v55  ;;  %v623_v0 = vclz %v1955_v9  ;;  %v1442_v57 = vmul.u32 %v2867_v50, %v1426_v6  ;;  %v644_v4 = vsel %vm2935_vm13, 0, %v642_v22 }
 0x1a5   :  { %v1172_v29 = vxor.u32 2147483648, %v2232_v46  ;;  %vm1444_vm0 = vc.u32 %v2918_v45, %v2911_v54  ;;  %v458_v13 = vand.u32 8388607, %v451_v51  ;;  %v1950_v48 = vadd.s32 4294967169, %v455_v38 }
 0x1a6   :  { %v1176_v62 = vsel %vm1174_vm15, %v1175_v61, %v2232_v46  ;;  %v1956_v32 = vadd.s32 4294967294, %v623_v0  ;;  %v1446_v39 = vsel %vm1444_vm0, %v1445_v56, %v2912_v60  ;;  %vm1167_vm1 = vweird.f32 %v2449_v14 }
 0x1a7   :  { %v1173_v19 = vsel %vm1171_vm14, %v2230_v55, %v1172_v29  ;;  %v1447_v21 = vadd.s32 %v1446_v39, %v1442_v57  ;;  %v2958_v49 = vmul.f32 30.0, %v199_v18  ;;  %v461_v35 = vadd.s32 1, %v1950_v48 }
 0x1a8   :  { %v1177_v50 = vsel %vm1170_vm12, %v1173_v19, %v1176_v62  ;;  %vm1957_vm2 = vcmp.lt.s32.totalorder %v1956_v32, 0  ;;  %v611_v42 = vadd.s32 %v2848_v7, %v2838_v36  ;;  %v648_v41 = vadd.s32 3, %v644_v4 }
 0x1a9   :  { %v1178_v16 = vsel %vm1167_vm1, nan, %v1177_v50  ;;  %v626_v15 = vsel %vm1957_vm2, 0, %v1956_v32  ;;  %v1448_v34 = vadd.s32 536870912, %v1447_v21  ;;  %v459_v3 = vor.u32 8388608, %v458_v13 }
 0x1aa   :  { %1915 = vst [vmem:[#allocation7 + $0x40] sm:$0xff] %v1178_v16  ;;  %v627_v31 = vsub.s32 32, %v626_v15  ;;  %v631_v23 = vsub.s32 4294967266, %v626_v15  ;;  %vm462_vm3 = vcmp.gt.s32.totalorder %v461_v35, 0  ;;  %v1283_v10 = vand.u32 2147483647, %v2958_v49 }
 0x1ab   :  { %v2962_v14 = vshrl.u32 %v1448_v34, 30  ;;  %v463_v5 = vsel %vm462_vm3, %v461_v35, 0  ;;  %v1286_v44 = vand.u32 2139095040, %v2958_v49  ;;  %v628_v53 = vshll.u32 %v2902_v52, %v626_v15 }
 0x1ac   :  { %v629_v27 = vshrl.u32 %v611_v42, %v627_v31  ;;  %v632_v60 = vadd.s32 127, %v631_v23  ;;  %v465_v59 = vand.u32 31, %v463_v5  ;;  %v2968_v6 = vand.u32 3, %v648_v41 }
 0x1ad   :  { %v1450_v36 = vshll.u32 %v2962_v14, 30  ;;  %v1443_v40 = vadd.s32 %v2911_v54, %v2918_v45  ;;  %v2974_v9 = vshll.u32 %v459_v3, 8  ;;  %v2976_v46 = vshrl.u32 %v463_v5, 5  ;;  %v3000_v5 = vpop.f32.mrb[6].mxu1 }
 0x1ae   :  { %v630_v7 = vor.u32 %v629_v27, %v628_v53  ;;  %v633_v47 = vshll.u32 %v632_v60, 23  ;;  %v466_v18 = vsub.s32 32, %v465_v59  ;;  %v1287_v52 = vshrl.u32 %v1286_v44, 23 }
 0x1af   :  { %v2972_v55 = vsub.s32 %v1447_v21, %v1450_v36  ;;  %v2980_v61 = vand.u32 8388607, %v1283_v10  ;;  %v474_v54 = vshll.u32 %v2361_v26, %v465_v59  ;;  %v468_v13 = vshll.u32 %v2359_v20, %v465_v59 }
 0x1b0   :  { %v634_v22 = vor.u32 4788187, %v633_v47  ;;  %v469_v38 = vshrl.u32 %v2360_v24, %v466_v18  ;;  %v472_v29 = vshrl.u32 %v2361_v26, %v466_v18  ;;  %v637_v0 = vcvt.s32.f32 %v630_v7 }
 0x1b1   :  { %v1453_v56 = vsub.s32 0, %v2972_v55  ;;  %v475_v57 = vshrl.u32 %v2362_v28, %v466_v18  ;;  %v478_v62 = vshrl.u32 %v2363_v30, %v466_v18  ;;  %v471_v19 = vshll.u32 %v2360_v24, %v465_v59 }
 0x1b2   :  { %v635_v45 = vand.u32 2147483647, %v634_v22  ;;  %v477_v32 = vshll.u32 %v2362_v28, %v465_v59  ;;  %v1473_v48 = vsub.s32 4, %v2962_v14  ;;  %v1982_v21 = vadd.s32 4294967169, %v1287_v52 }
 0x1b3   :  { %v1987_v4 = vmin.u32 %v1453_v56, %v2972_v55  ;;  %v476_v50 = vor.u32 %v475_v57, %v474_v54  ;;  %vm1389_vm4 = vcmp.lt.s32.totalorder %v2764_v17, 0  ;;  %v470_v35 = vor.u32 %v469_v38, %v468_v13 }
 0x1b4   :  { %v638_v39 = vmul.f32 %v637_v0, %v635_v45  ;;  %v473_v42 = vor.u32 %v472_v29, %v471_v19  ;;  %v479_v15 = vor.u32 %v478_v62, %v477_v32  ;;  %v467_v34 = vshrl.u32 %v2359_v20, %v466_v18 }
 0x1b5   :  { %v1455_v16 = vclz %v1987_v4  ;;  %v480_v31 = vshll.u32 %v2363_v30, %v465_v59  ;;  %v481_v23 = vshrl.u32 %v2364_v37, %v466_v18  ;;  %vm483_vm5 = vcmp.lt.s32.totalorder %v2976_v46, 1 }
 0x1b6   :  { %v639_v41 = vxor.u32 2147483648, %v638_v39  ;;  %vm484_vm6 = vcmp.lt.s32.totalorder %v2976_v46, 2  ;;  %vm486_vm7 = vcmp.lt.s32.totalorder %v2976_v46, 4  ;;  %vm485_vm8 = vcmp.lt.s32.totalorder %v2976_v46, 3 }
 0x1b7   :  { %v1988_v3 = vadd.s32 4294967294, %v1455_v16  ;;  %v482_v53 = vor.u32 %v481_v23, %v480_v31  ;;  %v488_v27 = vsel %vm486_vm7, %v476_v50, 2102212464  ;;  %v491_v59 = vsel %vm483_vm5, %v470_v35, %v473_v42 }
 0x1b8   :  { %v640_v44 = vsel %vm557_vm11, %v639_v41, %v638_v39  ;;  %v492_v36 = vsel %vm486_vm7, %v479_v15, 920167782  ;;  %v487_v47 = vsel %vm483_vm5, %v467_v34, %v470_v35  ;;  %v489_v58 = vsel %vm485_vm8, %v473_v42, %v488_v27 }
 0x1b9   :  { %v643_v60 = vsel %vm2935_vm13, %v2732_v25, %v640_v44  ;;  %vm1989_vm9 = vcmp.lt.s32.totalorder %v1988_v3, 0  ;;  %v493_v18 = vsel %vm485_vm8, %v476_v50, %v492_v36  ;;  %v495_v29 = vsel %vm483_vm5, %v473_v42, %v476_v50 }
 0x1ba   :  { %2233 = vcosq.f32 %v643_v60  ;;  %v1458_v7 = vsel %vm1989_vm9, 0, %v1988_v3  ;;  %v494_v38 = vsel %vm484_vm6, %v491_v59, %v493_v18  ;;  %v496_v54 = vsel %vm486_vm7, %v482_v53, 1326507024 }
 0x1bb   :  { %2235 = vsinq.f32 %v643_v60  ;;  %v1459_v22 = vsub.s32 32, %v1458_v7  ;;  %v1463_v52 = vsub.s32 4294967266, %v1458_v7  ;;  %v1460_v56 = vshll.u32 %v2972_v55, %v1458_v7 }
 0x1bc   :  { %v497_v57 = vsel %vm485_vm8, %v479_v15, %v496_v54  ;;  %v1293_v62 = vadd.s32 1, %v1982_v21  ;;  %v1474_v4 = vsel %vm1389_vm4, %v1473_v48, %v2962_v14  ;;  %vm650_vm10 = vcmp.lt.s32.totalorder %v2968_v6, 2 }
 0x1bd   :  { %v1461_v45 = vshrl.u32 %v1443_v40, %v1459_v22  ;;  %v1464_v0 = vadd.s32 127, %v1463_v52  ;;  %v498_v55 = vsel %vm484_vm6, %v495_v29, %v497_v57  ;;  %vm3046_vm11 = vcmp.le.f32.partialorder %v1387_v11, 0.7853982 }
 0x1be   :  { %v3035_v13 = vmul.u32.u64.low %v2974_v9, %v494_v38  ;;  %v3036_v19 = vmul.u32.u64.high %v2974_v9, %v494_v38, %v3035_v13  ;;  %v3040_v40 = vmul.u32.u64.low %v2974_v9, %v498_v55  ;;  %v3041_v50 = vmul.u32.u64.high %v2974_v9, %v498_v55, %v3040_v40 }
 0x1bf   :  { %v1462_v32 = vor.u32 %v1461_v45, %v1460_v56  ;;  %v1465_v39 = vshll.u32 %v1464_v0, 23  ;;  %v490_v48 = vsel %vm484_vm6, %v487_v47, %v489_v58  ;;  %vm1294_vm12 = vcmp.gt.s32.totalorder %v1293_v62, 0 }
 0x1c0   :  { %vm647_vm13 = vweird.f32 %v2732_v25  ;;  %vm651_vm14 = vcmp.eq.s32.totalorder %v2968_v6, 0  ;;  %v1476_v16 = vsel %vm3046_vm11, 0, %v1474_v4  ;;  %v1295_v35 = vsel %vm1294_vm12, %v1293_v62, 0 }
 0x1c1   :  { %v1466_v21 = vor.u32 4788187, %v1465_v39  ;;  %vm654_vm15 = vcmp.eq.s32.totalorder %v2968_v6, 2  ;;  %v509_v11 = vadd.s32 1, %v3036_v19  ;;  %v1291_v42 = vor.u32 8388608, %v2980_v61 }
 0x1c2   :  { %v1297_v15 = vand.u32 31, %v1295_v35  ;;  %v1469_v46 = vcvt.s32.f32 %v1462_v32  ;;  %v506_v34 = vmul.u32 %v2974_v9, %v490_v48  ;;  %vm508_vm0 = vc.u32 %v3041_v50, %v3035_v13 }
 0x1c3   :  { %v1467_v41 = vand.u32 2147483647, %v1466_v21  ;;  %v1480_v23 = vadd.s32 3, %v1476_v16  ;;  %v510_v3 = vsel %vm508_vm0, %v509_v11, %v3036_v19  ;;  %v3063_v44 = vshrl.u32 %v1295_v35, 5 }
 0x1c4   :  { %v2234_v31 = vpop.eup %2233  ;;  %v1298_v53 = vsub.s32 32, %v1297_v15  ;;  %v511_v36 = vadd.s32 %v510_v3, %v506_v34  ;;  %v1300_v61 = vshll.u32 %v2359_v20, %v1297_v15  ;;  %v1303_v9 = vshll.u32 %v2360_v24, %v1297_v15 }
 0x1c5   :  { %v2236_v27 = vpop.eup %2235  ;;  %v655_v60 = vxor.u32 2147483648, %v2234_v31  ;;  %v1470_v59 = vmul.f32 %v1469_v46, %v1467_v41  ;;  %v1306_v45 = vshll.u32 %v2361_v26, %v1297_v15  ;;  %v1309_v4 = vshll.u32 %v2362_v28, %v1297_v15 }
 0x1c6   :  { %v652_v7 = vxor.u32 2147483648, %v2236_v27  ;;  %v1301_v47 = vshrl.u32 %v2360_v24, %v1298_v53  ;;  %v1304_v18 = vshrl.u32 %v2361_v26, %v1298_v53  ;;  %v512_v58 = vadd.s32 536870912, %v511_v36 }
 0x1c7   :  { %v656_v22 = vsel %vm654_vm15, %v655_v60, %v2236_v27  ;;  %v1471_v52 = vxor.u32 2147483648, %v1470_v59  ;;  %v1307_v56 = vshrl.u32 %v2362_v28, %v1298_v53  ;;  %v1310_v39 = vshrl.u32 %v2363_v30, %v1298_v53 }
 0x1c8   :  { %v653_v38 = vsel %vm651_vm14, %v2234_v31, %v652_v7  ;;  %v1302_v29 = vor.u32 %v1301_v47, %v1300_v61  ;;  %v1305_v54 = vor.u32 %v1304_v18, %v1303_v9  ;;  %v513_v62 = vshrl.u32 %v512_v58, 30 }
 0x1c9   :  { %v657_v0 = vsel %vm650_vm10, %v653_v38, %v656_v22  ;;  %v1472_v57 = vsel %vm1389_vm4, %v1471_v52, %v1470_v59  ;;  %v1308_v32 = vor.u32 %v1307_v56, %v1306_v45  ;;  %v1312_v40 = vshll.u32 %v2363_v30, %v1297_v15 }
 0x1ca   :  { %v658_v55 = vsel %vm647_vm13, nan, %v657_v0  ;;  %v1475_v19 = vsel %vm3046_vm11, %v2764_v17, %v1472_v57  ;;  %v514_v6 = vshll.u32 %v513_v62, 30  ;;  %v1313_v48 = vshrl.u32 %v2364_v37, %v1298_v53 }
 0x1cb   :  { %1910 = vst [vmem:[#allocation7 + $0x18] sm:$0xff] %v658_v55  ;;  %2237 = vcosq.f32 %v1475_v19  ;;  %v1311_v21 = vor.u32 %v1310_v39, %v1309_v4  ;;  %v174_v25 = vadd.f32 %v2923_v43, %v2526_v1  ;;  %v1481_v16 = vand.u32 3, %v1480_v23  ;;  %v3137_v39 = vpop.f32.mrb[7].mxu0 }
 0x1cc   :  { %2239 = vsinq.f32 %v1475_v19  ;;  %v3090_v35 = vsub.s32 %v511_v36, %v514_v6  ;;  %v1314_v14 = vor.u32 %v1313_v48, %v1312_v40  ;;  %vm1315_vm1 = vcmp.lt.s32.totalorder %v3063_v44, 1 }
 0x1cd   :  { %vm453_vm2 = vcmp.lt.s32.totalorder %v2900_v8, 0  ;;  %v1299_v11 = vshrl.u32 %v2359_v20, %v1298_v53  ;;  %vm1318_vm3 = vcmp.lt.s32.totalorder %v3063_v44, 4  ;;  %v1323_v15 = vsel %vm1315_vm1, %v1302_v29, %v1305_v54 }
 0x1ce   :  { %v1331_v41 = vshll.u32 %v1291_v42, 8  ;;  %v517_v46 = vsub.s32 0, %v3090_v35  ;;  %vm1317_vm4 = vcmp.lt.s32.totalorder %v3063_v44, 3  ;;  %v1320_v1 = vsel %vm1318_vm3, %v1308_v32, 2102212464 }
 0x1cf   :  { %v1324_v34 = vsel %vm1318_vm3, %v1311_v21, 920167782  ;;  %vm1316_vm5 = vcmp.lt.s32.totalorder %v3063_v44, 2  ;;  %v1328_v23 = vsel %vm1318_vm3, %v1314_v14, 1326507024  ;;  %v3101_v3 = vmul.f32 30.0, %v174_v25 }
 0x1d0   :  { %v1325_v31 = vsel %vm1317_vm4, %v1308_v32, %v1324_v34  ;;  %v1951_v53 = vmin.u32 %v517_v46, %v3090_v35  ;;  %v1319_v27 = vsel %vm1315_vm1, %v1299_v11, %v1302_v29  ;;  %v1327_v60 = vsel %vm1315_vm1, %v1305_v54, %v1308_v32 }
 0x1d1   :  { %v1326_v42 = vsel %vm1316_vm5, %v1323_v15, %v1325_v31  ;;  %vm1479_vm6 = vweird.f32 %v2764_v17  ;;  %v1321_v59 = vsel %vm1317_vm4, %v1305_v54, %v1320_v1  ;;  %v1329_v36 = vsel %vm1317_vm4, %v1311_v21, %v1328_v23 }
 0x1d2   :  { %v3111_v61 = vmul.u32.u64.low %v1331_v41, %v1326_v42  ;;  %v3112_v7 = vmul.u32.u64.high %v1331_v41, %v1326_v42, %v3111_v61  ;;  %vm1482_vm7 = vcmp.lt.s32.totalorder %v1481_v16, 2  ;;  %vm3117_vm8 = vcmp.le.f32.partialorder %v451_v51, 0.7853982 }
 0x1d3   :  { %v519_v9 = vclz %v1951_v53  ;;  %v537_v18 = vsub.s32 4, %v513_v62  ;;  %v214_v22 = vadd.f32 %v2923_v43, %v2622_v63  ;;  %vm1483_vm9 = vcmp.eq.s32.totalorder %v1481_v16, 0 }
 0x1d4   :  { %v1330_v52 = vsel %vm1316_vm5, %v1327_v60, %v1329_v36  ;;  %v763_v58 = vand.u32 2147483647, %v3101_v3  ;;  %v766_v56 = vand.u32 2139095040, %v3101_v3  ;;  %v1322_v51 = vsel %vm1316_vm5, %v1319_v27, %v1321_v59 }
 0x1d5   :  { %v2238_v38 = vpop.eup %2237  ;;  %v1952_v29 = vadd.s32 4294967294, %v519_v9  ;;  %v3129_v54 = vmul.u32.u64.low %v1331_v41, %v1330_v52  ;;  %v3130_v45 = vmul.u32.u64.high %v1331_v41, %v1330_v52, %v3129_v54  ;;  %vm1486_vm10 = vcmp.eq.s32.totalorder %v1481_v16, 2 }
 0x1d6   :  { %v2240_v0 = vpop.eup %2239  ;;  %v1487_v57 = vxor.u32 2147483648, %v2238_v38  ;;  %v507_v63 = vadd.s32 %v3035_v13, %v3041_v50  ;;  %v767_v4 = vshrl.u32 %v766_v56, 23  ;;  %v538_v19 = vsel %vm453_vm2, %v537_v18, %v513_v62 }
 0x1d7   :  { %v1484_v55 = vxor.u32 2147483648, %v2240_v0  ;;  %vm1953_vm11 = vcmp.lt.s32.totalorder %v1952_v29, 0  ;;  %v1341_v32 = vadd.s32 1, %v3112_v7  ;;  %v1338_v40 = vmul.u32 %v1331_v41, %v1322_v51 }
 0x1d8   :  { %v1488_v44 = vsel %vm1486_vm10, %v1487_v57, %v2240_v0  ;;  %v522_v6 = vsel %vm1953_vm11, 0, %v1952_v29  ;;  %v1962_v48 = vadd.s32 4294967169, %v767_v4  ;;  %v770_v13 = vand.u32 8388607, %v763_v58 }
 0x1d9   :  { %v1485_v21 = vsel %vm1483_vm9, %v2238_v38, %v1484_v55  ;;  %v523_v25 = vsub.s32 32, %v522_v6  ;;  %v527_v14 = vsub.s32 4294967266, %v522_v6  ;;  %v524_v11 = vshll.u32 %v3090_v35, %v522_v6 }
 0x1da   :  { %v1489_v50 = vsel %vm1482_vm7, %v1485_v21, %v1488_v44  ;;  %vm1340_vm12 = vc.u32 %v3130_v45, %v3111_v61  ;;  %v773_v62 = vadd.s32 1, %v1962_v48  ;;  %v540_v34 = vsel %vm3117_vm8, 0, %v538_v19 }
 0x1db   :  { %v1490_v15 = vsel %vm1479_vm6, nan, %v1489_v50  ;;  %v525_v41 = vshrl.u32 %v507_v63, %v523_v25  ;;  %v528_v46 = vadd.s32 127, %v527_v14  ;;  %v1342_v1 = vsel %vm1340_vm12, %v1341_v32, %v3112_v7 }
 0x1dc   :  { %1918 = vst [vmem:[#allocation7 + $0x58] sm:$0xff] %v1490_v15  ;;  %v1343_v31 = vadd.s32 %v1342_v1, %v1338_v40  ;;  %vm774_vm13 = vcmp.gt.s32.totalorder %v773_v62, 0  ;;  %v3151_v16 = vmul.f32 30.0, %v214_v22  ;;  %v771_v53 = vor.u32 8388608, %v770_v13 }
 0x1dd   :  { %v526_v35 = vor.u32 %v525_v41, %v524_v11  ;;  %v529_v23 = vshll.u32 %v528_v46, 23  ;;  %v775_v27 = vsel %vm774_vm13, %v773_v62, 0  ;;  %v3153_v59 = vadd.s32 3, %v540_v34 }
 0x1de   :  { %v1344_v42 = vadd.s32 536870912, %v1343_v31  ;;  %v777_v60 = vand.u32 31, %v775_v27  ;;  %v3157_v52 = vshll.u32 %v771_v53, 8  ;;  %v1595_v56 = vand.u32 2147483647, %v3151_v16 }
 0x1df   :  { %v530_v17 = vor.u32 4788187, %v529_v23  ;;  %v533_v18 = vcvt.s32.f32 %v526_v35  ;;  %v1598_v51 = vand.u32 2139095040, %v3151_v16  ;;  %v776_v6 = vshrl.u32 %v775_v27, 5 }
 0x1e0   :  { %v3155_v36 = vshrl.u32 %v1344_v42, 30  ;;  %v778_v7 = vsub.s32 32, %v777_v60  ;;  %v780_v38 = vshll.u32 %v2359_v20, %v777_v60  ;;  %v783_v55 = vshll.u32 %v2360_v24, %v777_v60 }
 0x1e1   :  { %v531_v9 = vand.u32 2147483647, %v530_v17  ;;  %v786_v19 = vshll.u32 %v2361_v26, %v777_v60  ;;  %v789_v40 = vshll.u32 %v2362_v28, %v777_v60  ;;  %v792_v48 = vshll.u32 %v2363_v30, %v777_v60 }
 0x1e2   :  { %v1346_v22 = vshll.u32 %v3155_v36, 30  ;;  %v781_v29 = vshrl.u32 %v2360_v24, %v778_v7  ;;  %v784_v0 = vshrl.u32 %v2361_v26, %v778_v7  ;;  %v787_v57 = vshrl.u32 %v2362_v28, %v778_v7 }
 0x1e3   :  { %v534_v54 = vmul.f32 %v533_v18, %v531_v9  ;;  %v790_v63 = vshrl.u32 %v2363_v30, %v778_v7  ;;  %v793_v32 = vshrl.u32 %v2364_v37, %v778_v7  ;;  %vm1285_vm14 = vcmp.lt.s32.totalorder %v2958_v49, 0 }
 0x1e4   :  { %v3167_v4 = vsub.s32 %v1343_v31, %v1346_v22  ;;  %v782_v25 = vor.u32 %v781_v29, %v780_v38  ;;  %v785_v14 = vor.u32 %v784_v0, %v783_v55  ;;  %v788_v13 = vor.u32 %v787_v57, %v786_v19 }
 0x1e5   :  { %v535_v44 = vxor.u32 2147483648, %v534_v54  ;;  %v1339_v11 = vadd.s32 %v3111_v61, %v3130_v45  ;;  %v791_v62 = vor.u32 %v790_v63, %v789_v40  ;;  %v1599_v15 = vshrl.u32 %v1598_v51, 23 }
 0x1e6   :  { %v1349_v21 = vsub.s32 0, %v3167_v4  ;;  %v1369_v1 = vsub.s32 4, %v3155_v36  ;;  %v794_v34 = vor.u32 %v793_v32, %v792_v48  ;;  %v779_v31 = vshrl.u32 %v2359_v20, %v778_v7  ;;  %v3192_v7 = vpop.f32.mrb[7].mxu1 }
 0x1e7   :  { %v536_v50 = vsel %vm453_vm2, %v535_v44, %v534_v54  ;;  %vm795_vm15 = vcmp.lt.s32.totalorder %v776_v6, 1  ;;  %vm798_vm0 = vcmp.lt.s32.totalorder %v776_v6, 4  ;;  %vm3188_vm1 = vcmp.le.f32.partialorder %v1283_v10, 0.7853982 }
 0x1e8   :  { %v539_v41 = vsel %vm3117_vm8, %v2900_v8, %v536_v50  ;;  %v1983_v46 = vmin.u32 %v1349_v21, %v3167_v4  ;;  %v800_v47 = vsel %vm798_vm0, %v788_v13, 2102212464  ;;  %v803_v35 = vsel %vm795_vm15, %v782_v25, %v785_v14 }
 0x1e9   :  { %2241 = vcosq.f32 %v539_v41  ;;  %vm796_vm2 = vcmp.lt.s32.totalorder %v776_v6, 2  ;;  %vm797_vm3 = vcmp.lt.s32.totalorder %v776_v6, 3  ;;  %v804_v23 = vsel %vm798_vm0, %v791_v62, 920167782 }
 0x1ea   :  { %2243 = vsinq.f32 %v539_v41  ;;  %v1351_v45 = vclz %v1983_v46  ;;  %v807_v53 = vsel %vm795_vm15, %v785_v14, %v788_v13  ;;  %v799_v42 = vsel %vm795_vm15, %v779_v31, %v782_v25 }
 0x1eb   :  { %v805_v60 = vsel %vm797_vm3, %v788_v13, %v804_v23  ;;  %v808_v17 = vsel %vm798_vm0, %v794_v34, 1326507024  ;;  %v801_v9 = vsel %vm797_vm3, %v785_v14, %v800_v47  ;;  %v1994_v22 = vadd.s32 4294967169, %v1599_v15 }
 0x1ec   :  { %v1984_v27 = vadd.s32 4294967294, %v1351_v45  ;;  %v806_v18 = vsel %vm796_vm2, %v803_v35, %v805_v60  ;;  %v809_v10 = vsel %vm797_vm3, %v791_v62, %v808_v17  ;;  %vm543_vm5 = vweird.f32 %v2900_v8 }
 0x1ed   :  { %v810_v38 = vsel %vm796_vm2, %v807_v53, %v809_v10  ;;  %v3197_v29 = vmul.u32.u64.low %v3157_v52, %v806_v18  ;;  %v3198_v51 = vmul.u32.u64.high %v3157_v52, %v806_v18, %v3197_v29  ;;  %v1605_v63 = vadd.s32 1, %v1994_v22 }
 0x1ee   :  { %vm1985_vm4 = vcmp.lt.s32.totalorder %v1984_v27, 0  ;;  %v3202_v0 = vmul.u32.u64.low %v3157_v52, %v810_v38  ;;  %v3203_v57 = vmul.u32.u64.high %v3157_v52, %v810_v38, %v3202_v0  ;;  %v1370_v32 = vsel %vm1285_vm14, %v1369_v1, %v3155_v36 }
 0x1ef   :  { %v1354_v54 = vsel %vm1985_vm4, 0, %v1984_v27  ;;  %v802_v44 = vsel %vm796_vm2, %v799_v42, %v801_v9  ;;  %v545_v40 = vand.u32 3, %v3153_v59  ;;  %v1602_v21 = vand.u32 8388607, %v1595_v56 }
 0x1f0   :  { %v1355_v55 = vsub.s32 32, %v1354_v54  ;;  %v1359_v19 = vsub.s32 4294967266, %v1354_v54  ;;  %v1356_v48 = vshll.u32 %v3167_v4, %v1354_v54  ;;  %vm1606_vm6 = vcmp.gt.s32.totalorder %v1605_v63, 0 }
 0x1f1   :  { %v821_v13 = vadd.s32 1, %v3198_v51  ;;  %v1607_v50 = vsel %vm1606_vm6, %v1605_v63, 0  ;;  %v1372_v15 = vsel %vm3188_vm1, 0, %v1370_v32  ;;  %v818_v36 = vmul.u32 %v3157_v52, %v802_v44 }
 0x1f2   :  { %v1357_v25 = vshrl.u32 %v1339_v11, %v1355_v55  ;;  %v1360_v14 = vadd.s32 127, %v1359_v19  ;;  %vm820_vm7 = vc.u32 %v3203_v57, %v3197_v29  ;;  %v1609_v59 = vand.u32 31, %v1607_v50 }
 0x1f3   :  { %v2242_v62 = vpop.eup %2241  ;;  %v822_v11 = vsel %vm820_vm7, %v821_v13, %v3198_v51  ;;  %vm550_vm8 = vcmp.eq.s32.totalorder %v545_v40, 2  ;;  %vm546_vm9 = vcmp.lt.s32.totalorder %v545_v40, 2  ;;  %vm547_vm10 = vcmp.eq.s32.totalorder %v545_v40, 0 }
 0x1f4   :  { %v2244_v4 = vpop.eup %2243  ;;  %v551_v6 = vxor.u32 2147483648, %v2242_v62  ;;  %v1358_v41 = vor.u32 %v1357_v25, %v1356_v48  ;;  %v1361_v46 = vshll.u32 %v1360_v14, 23  ;;  %v823_v34 = vadd.s32 %v822_v11, %v818_v36 }
 0x1f5   :  { %v548_v1 = vxor.u32 2147483648, %v2244_v4  ;;  %v1610_v31 = vsub.s32 32, %v1609_v59  ;;  %v1376_v52 = vadd.s32 3, %v1372_v15  ;;  %v1603_v53 = vor.u32 8388608, %v1602_v21 }
 0x1f6   :  { %v552_v45 = vsel %vm550_vm8, %v551_v6, %v2244_v4  ;;  %v1362_v47 = vor.u32 4788187, %v1361_v46  ;;  %v824_v23 = vadd.s32 536870912, %v823_v34  ;;  %v1365_v60 = vcvt.s32.f32 %v1358_v41 }
 0x1f7   :  { %v549_v35 = vsel %vm547_vm10, %v2242_v62, %v548_v1  ;;  %v1613_v17 = vshrl.u32 %v2360_v24, %v1610_v31  ;;  %v1616_v10 = vshrl.u32 %v2361_v26, %v1610_v31  ;;  %v1619_v22 = vshrl.u32 %v2362_v28, %v1610_v31 }
 0x1f8   :  { %v553_v27 = vsel %vm546_vm9, %v549_v35, %v552_v45  ;;  %v1363_v42 = vand.u32 2147483647, %v1362_v47  ;;  %v3224_v18 = vshrl.u32 %v824_v23, 30  ;;  %v1608_v51 = vshrl.u32 %v1607_v50, 5 }
 0x1f9   :  { %v554_v9 = vsel %vm543_vm5, nan, %v553_v27  ;;  %v1621_v54 = vshll.u32 %v2362_v28, %v1609_v59  ;;  %v1622_v0 = vshrl.u32 %v2363_v30, %v1610_v31  ;;  %v1612_v55 = vshll.u32 %v2359_v20, %v1609_v59 }
 0x1fa   :  { %1909 = vst [vmem:[#allocation7 + $0x10] sm:$0xff] %v554_v9  ;;  %v1366_v38 = vmul.f32 %v1365_v60, %v1363_v42  ;;  %v826_v63 = vshll.u32 %v3224_v18, 30  ;;  %v1615_v8 = vshll.u32 %v2360_v24, %v1609_v59  ;;  %v1618_v19 = vshll.u32 %v2361_v26, %v1609_v59 }
 0x1fb   :  { %v1623_v44 = vor.u32 %v1622_v0, %v1621_v54  ;;  %v1624_v40 = vshll.u32 %v2363_v30, %v1609_v59  ;;  %v1625_v48 = vshrl.u32 %v2364_v37, %v1610_v31  ;;  %v1614_v25 = vor.u32 %v1613_v17, %v1612_v55 }
 0x1fc   :  { %v1367_v32 = vxor.u32 2147483648, %v1366_v38  ;;  %v3236_v21 = vsub.s32 %v823_v34, %v826_v63  ;;  %v1617_v14 = vor.u32 %v1616_v10, %v1615_v8  ;;  %v1620_v13 = vor.u32 %v1619_v22, %v1618_v19 }
 0x1fd   :  { %v3240_v62 = vand.u32 3, %v1376_v52  ;;  %v1626_v15 = vor.u32 %v1625_v48, %v1624_v40  ;;  %v169_v36 = vadd.f32 %v2923_v43, %v2727_v12  ;;  %vm765_vm11 = vcmp.lt.s32.totalorder %v3101_v3, 0 }
 0x1fe   :  { %v1368_v50 = vsel %vm1285_vm14, %v1367_v32, %v1366_v38  ;;  %v829_v4 = vsub.s32 0, %v3236_v21  ;;  %vm1630_vm12 = vcmp.lt.s32.totalorder %v1608_v51, 4  ;;  %v1643_v6 = vshll.u32 %v1603_v53, 8 }
 0x1ff   :  { %v1371_v59 = vsel %vm3188_vm1, %v2958_v49, %v1368_v50  ;;  %vm1627_vm13 = vcmp.lt.s32.totalorder %v1608_v51, 1  ;;  %vm1629_vm15 = vcmp.lt.s32.totalorder %v1608_v51, 3  ;;  %v1636_v41 = vsel %vm1630_vm12, %v1623_v44, 920167782 }
 0x200   :  { %2245 = vcosq.f32 %v1371_v59  ;;  %v1963_v46 = vmin.u32 %v829_v4, %v3236_v21  ;;  %v1632_v11 = vsel %vm1630_vm12, %v1620_v13, 2102212464  ;;  %v1635_v1 = vsel %vm1627_vm13, %v1614_v25, %v1617_v14 }
 0x201   :  { %2247 = vsinq.f32 %v1371_v59  ;;  %v1611_v12 = vshrl.u32 %v2359_v20, %v1610_v31  ;;  %v1637_v61 = vsel %vm1629_vm15, %v1620_v13, %v1636_v41  ;;  %v1639_v34 = vsel %vm1627_vm13, %v1617_v14, %v1620_v13 }
 0x202   :  { %v1640_v45 = vsel %vm1630_vm12, %v1626_v15, 1326507024  ;;  %v831_v47 = vclz %v1963_v46  ;;  %v849_v35 = vsub.s32 4, %v3224_v18  ;;  %vm1628_vm14 = vcmp.lt.s32.totalorder %v1608_v51, 2 }
 0x203   :  { %v3253_v52 = vmul.f32 30.0, %v169_v36  ;;  %v1631_v23 = vsel %vm1627_vm13, %v1611_v12, %v1614_v25  ;;  %v1633_v53 = vsel %vm1629_vm15, %v1617_v14, %v1632_v11  ;;  %v1638_v27 = vsel %vm1628_vm14, %v1635_v1, %v1637_v61 }
 0x204   :  { %v1641_v42 = vsel %vm1629_vm15, %v1623_v44, %v1640_v45  ;;  %v1964_v60 = vadd.s32 4294967294, %v831_v47  ;;  %v3257_v9 = vmul.u32.u64.low %v1643_v6, %v1638_v27  ;;  %v3258_v31 = vmul.u32.u64.high %v1643_v6, %v1638_v27, %v3257_v9 }
 0x205   :  { %v1642_v17 = vsel %vm1628_vm14, %v1639_v34, %v1641_v42  ;;  %vm1379_vm0 = vcmp.eq.s32.totalorder %v3240_v62, 0  ;;  %vm3263_vm1 = vcmp.le.f32.partialorder %v763_v58, 0.7853982  ;;  %vm1375_vm2 = vweird.f32 %v2958_v49 }
 0x206   :  { %v3267_v22 = vmul.u32.u64.low %v1643_v6, %v1642_v17  ;;  %v3268_v38 = vmul.u32.u64.high %v1643_v6, %v1642_v17, %v3267_v22  ;;  %vm1382_vm3 = vcmp.eq.s32.totalorder %v3240_v62, 2  ;;  %vm1965_vm4 = vcmp.lt.s32.totalorder %v1964_v60, 0 }
 0x207   :  { %v1634_v51 = vsel %vm1628_vm14, %v1631_v23, %v1633_v53  ;;  %v662_v54 = vand.u32 2139095040, %v3253_v52  ;;  %v819_v0 = vadd.s32 %v3197_v29, %v3203_v57  ;;  %v834_v63 = vsel %vm1965_vm4, 0, %v1964_v60 }
 0x208   :  { %v850_v58 = vsel %vm765_vm11, %v849_v35, %v3224_v18  ;;  %v209_v55 = vadd.f32 %v2923_v43, %v2834_v33  ;;  %v835_v8 = vsub.s32 32, %v834_v63  ;;  %v839_v19 = vsub.s32 4294967266, %v834_v63 }
 0x209   :  { %v1653_v32 = vadd.s32 1, %v3258_v31  ;;  %v659_v44 = vand.u32 2147483647, %v3253_v52  ;;  %v836_v48 = vshll.u32 %v3236_v21, %v834_v63  ;;  %v1650_v25 = vmul.u32 %v1643_v6, %v1634_v51 }
 0x20a   :  { %v2246_v40 = vpop.eup %2245  ;;  %vm1652_vm5 = vc.u32 %v3268_v38, %v3257_v9  ;;  %v663_v29 = vshrl.u32 %v662_v54, 23  ;;  %v837_v13 = vshrl.u32 %v819_v0, %v835_v8  ;;  %v840_v18 = vadd.s32 127, %v839_v19 }
 0x20b   :  { %v2248_v57 = vpop.eup %2247  ;;  %v1383_v14 = vxor.u32 2147483648, %v2246_v40  ;;  %v1654_v50 = vsel %vm1652_vm5, %v1653_v32, %v3258_v31  ;;  %v852_v15 = vsel %vm3263_vm1, 0, %v850_v58  ;;  %v666_v41 = vand.u32 8388607, %v659_v44 }
 0x20c   :  { %v1380_v33 = vxor.u32 2147483648, %v2248_v57  ;;  %v1655_v36 = vadd.s32 %v1654_v50, %v1650_v25  ;;  %v1958_v59 = vadd.s32 4294967169, %v663_v29  ;;  %v838_v21 = vor.u32 %v837_v13, %v836_v48 }
 0x20d   :  { %v1384_v4 = vsel %vm1382_vm3, %v1383_v14, %v2248_v57  ;;  %v841_v6 = vshll.u32 %v840_v18, 23  ;;  %vm1378_vm6 = vcmp.lt.s32.totalorder %v3240_v62, 2  ;;  %v856_v34 = vadd.s32 3, %v852_v15 }
 0x20e   :  { %v1381_v46 = vsel %vm1379_vm0, %v2246_v40, %v1380_v33  ;;  %v1656_v11 = vadd.s32 536870912, %v1655_v36  ;;  %v669_v1 = vadd.s32 1, %v1958_v59  ;;  %v184_v45 = vadd.f32 %v2923_v43, %v2946_v2 }
 0x20f   :  { %v1385_v12 = vsel %vm1378_vm6, %v1381_v46, %v1384_v4  ;;  %v842_v61 = vor.u32 4788187, %v841_v6  ;;  %v3300_v23 = vmul.f32 30.0, %v209_v55  ;;  %v845_v62 = vcvt.s32.f32 %v838_v21 }
 0x210   :  { %v1386_v47 = vsel %vm1375_vm2, nan, %v1385_v12  ;;  %v3298_v35 = vshrl.u32 %v1656_v11, 30  ;;  %vm670_vm7 = vcmp.gt.s32.totalorder %v669_v1, 0  ;;  %v667_v27 = vor.u32 8388608, %v666_v41 }
 0x211   :  { %1917 = vst [vmem:[#allocation7 + $0x50] sm:$0xff] %v1386_v47  ;;  %v843_v53 = vand.u32 2147483647, %v842_v61  ;;  %v671_v42 = vsel %vm670_vm7, %v669_v1, 0  ;;  %v3303_v22 = vand.u32 3, %v856_v34  ;;  %v1651_v43 = vadd.s32 %v3257_v9, %v3268_v38 }
 0x212   :  { %v1658_v60 = vshll.u32 %v3298_v35, 30  ;;  %v673_v17 = vand.u32 31, %v671_v42  ;;  %v3308_v51 = vmul.f32 30.0, %v184_v45  ;;  %v3310_v0 = vshll.u32 %v667_v27, 8 }
 0x213   :  { %v846_v31 = vmul.f32 %v845_v62, %v843_v53  ;;  %v1491_v63 = vand.u32 2147483647, %v3300_v23  ;;  %v1494_v58 = vand.u32 2139095040, %v3300_v23  ;;  %v672_v8 = vshrl.u32 %v671_v42, 5 }
 0x214   :  { %v3306_v2 = vsub.s32 %v1655_v36, %v1658_v60  ;;  %v674_v49 = vsub.s32 32, %v673_v17  ;;  %v676_v19 = vshll.u32 %v2359_v20, %v673_v17  ;;  %vm1597_vm8 = vcmp.lt.s32.totalorder %v3151_v16, 0 }
 0x215   :  { %v847_v54 = vxor.u32 2147483648, %v846_v31  ;;  %v679_v38 = vshll.u32 %v2360_v24, %v673_v17  ;;  %v682_v57 = vshll.u32 %v2361_v26, %v673_v17  ;;  %v685_v14 = vshll.u32 %v2362_v28, %v673_v17 }
 0x216   :  { %v1661_v55 = vsub.s32 0, %v3306_v2  ;;  %v677_v32 = vshrl.u32 %v2360_v24, %v674_v49  ;;  %v680_v40 = vshrl.u32 %v2361_v26, %v674_v49  ;;  %v683_v48 = vshrl.u32 %v2362_v28, %v674_v49 }
 0x217   :  { %v848_v9 = vsel %vm765_vm11, %v847_v54, %v846_v31  ;;  %v686_v50 = vshrl.u32 %v2363_v30, %v674_v49  ;;  %v1681_v15 = vsub.s32 4, %v3298_v35  ;;  %v675_v59 = vshrl.u32 %v2359_v20, %v674_v49 }
 0x218   :  { %v851_v25 = vsel %vm3263_vm1, %v3101_v3, %v848_v9  ;;  %v1995_v29 = vmin.u32 %v1661_v55, %v3306_v2  ;;  %v678_v13 = vor.u32 %v677_v32, %v676_v19  ;;  %v681_v18 = vor.u32 %v680_v40, %v679_v38 }
 0x219   :  { %2249 = vcosq.f32 %v851_v25  ;;  %v684_v36 = vor.u32 %v683_v48, %v682_v57  ;;  %v687_v10 = vor.u32 %v686_v50, %v685_v14  ;;  %v688_v4 = vshll.u32 %v2363_v30, %v673_v17 }
 0x21a   :  { %2251 = vsinq.f32 %v851_v25  ;;  %v1663_v33 = vclz %v1995_v29  ;;  %v689_v21 = vshrl.u32 %v2364_v37, %v674_v49  ;;  %vm3336_vm9 = vcmp.le.f32.partialorder %v1595_v56, 0.7853982 }
 0x21b   :  { %vm691_vm10 = vcmp.lt.s32.totalorder %v672_v8, 1  ;;  %vm693_vm11 = vcmp.lt.s32.totalorder %v672_v8, 3  ;;  %v1495_v46 = vshrl.u32 %v1494_v58, 23  ;;  %vm694_vm12 = vcmp.lt.s32.totalorder %v672_v8, 4 }
 0x21c   :  { %v1996_v41 = vadd.s32 4294967294, %v1663_v33  ;;  %v690_v11 = vor.u32 %v689_v21, %v688_v4  ;;  %v695_v1 = vsel %vm691_vm10, %v675_v59, %v678_v13  ;;  %v699_v12 = vsel %vm691_vm10, %v678_v13, %v681_v18 }
 0x21d   :  { %vm859_vm13 = vcmp.eq.s32.totalorder %v3303_v22, 0  ;;  %v696_v61 = vsel %vm694_vm12, %v684_v36, 2102212464  ;;  %v700_v34 = vsel %vm694_vm12, %v687_v10, 920167782  ;;  %v703_v45 = vsel %vm691_vm10, %v681_v18, %v684_v36 }
 0x21e   :  { %vm1997_vm15 = vcmp.lt.s32.totalorder %v1996_v41, 0  ;;  %vm858_vm14 = vcmp.lt.s32.totalorder %v3303_v22, 2  ;;  %v697_v47 = vsel %vm693_vm11, %v681_v18, %v696_v61  ;;  %v701_v53 = vsel %vm693_vm11, %v684_v36, %v700_v34 }
 0x21f   :  { %v1666_v56 = vsel %vm1997_vm15, 0, %v1996_v41  ;;  %v704_v62 = vsel %vm694_vm12, %v690_v11, 1326507024  ;;  %vm855_vm0 = vweird.f32 %v3101_v3  ;;  %v1682_v60 = vsel %vm1597_vm8, %v1681_v15, %v3298_v35 }
 0x220   :  { %v1667_v27 = vsub.s32 32, %v1666_v56  ;;  %v1671_v42 = vsub.s32 4294967266, %v1666_v56  ;;  %vm692_vm1 = vcmp.lt.s32.totalorder %v672_v8, 2  ;;  %v1668_v17 = vshll.u32 %v3306_v2, %v1666_v56 }
 0x221   :  { %v702_v31 = vsel %vm692_vm1, %v699_v12, %v701_v53  ;;  %v705_v49 = vsel %vm693_vm11, %v687_v10, %v704_v62  ;;  %v1990_v54 = vadd.s32 4294967169, %v1495_v46  ;;  %v698_v19 = vsel %vm692_vm1, %v695_v1, %v697_v47 }
 0x222   :  { %v1669_v58 = vshrl.u32 %v1651_v43, %v1667_v27  ;;  %v1672_v55 = vadd.s32 127, %v1671_v42  ;;  %v706_v32 = vsel %vm692_vm1, %v703_v45, %v705_v49  ;;  %vm862_vm2 = vcmp.eq.s32.totalorder %v3303_v22, 2 }
 0x223   :  { %v2250_v9 = vpop.eup %2249  ;;  %v3351_v38 = vmul.u32.u64.low %v3310_v0, %v706_v32  ;;  %v3352_v40 = vmul.u32.u64.high %v3310_v0, %v706_v32, %v3351_v38  ;;  %v3355_v48 = vmul.u32.u64.low %v3310_v0, %v702_v31  ;;  %v3356_v25 = vmul.u32.u64.high %v3310_v0, %v702_v31, %v3355_v48 }
 0x224   :  { %v2252_v35 = vpop.eup %2251  ;;  %v863_v2 = vxor.u32 2147483648, %v2250_v9  ;;  %v1670_v29 = vor.u32 %v1669_v58, %v1668_v17  ;;  %v1673_v8 = vshll.u32 %v1672_v55, 23  ;;  %v1501_v57 = vadd.s32 1, %v1990_v54 }
 0x225   :  { %v860_v14 = vxor.u32 2147483648, %v2252_v35  ;;  %v1684_v43 = vsel %vm3336_vm9, 0, %v1682_v60  ;;  %v1498_v13 = vand.u32 8388607, %v1491_v63  ;;  %v714_v33 = vmul.u32 %v3310_v0, %v698_v19 }
 0x226   :  { %v864_v18 = vsel %vm862_vm2, %v863_v2, %v2252_v35  ;;  %v1674_v50 = vor.u32 4788187, %v1673_v8  ;;  %vm1502_vm3 = vcmp.gt.s32.totalorder %v1501_v57, 0  ;;  %vm716_vm4 = vc.u32 %v3352_v40, %v3355_v48 }
 0x227   :  { %v861_v15 = vsel %vm859_vm13, %v2250_v9, %v860_v14  ;;  %v717_v36 = vadd.s32 1, %v3356_v25  ;;  %v974_v59 = vand.u32 2139095040, %v3308_v51  ;;  %v1677_v21 = vcvt.s32.f32 %v1670_v29 }
 0x228   :  { %v865_v10 = vsel %vm858_vm14, %v861_v15, %v864_v18  ;;  %v1675_v4 = vand.u32 2147483647, %v1674_v50  ;;  %v1503_v41 = vsel %vm1502_vm3, %v1501_v57, 0  ;;  %v1688_v12 = vadd.s32 3, %v1684_v43 }
 0x229   :  { %v866_v0 = vsel %vm855_vm0, nan, %v865_v10  ;;  %v718_v46 = vsel %vm716_vm4, %v717_v36, %v3356_v25  ;;  %v1505_v11 = vand.u32 31, %v1503_v41  ;;  %v1499_v34 = vor.u32 8388608, %v1498_v13 }
 0x22a   :  { %1912 = vst [vmem:[#allocation7 + $0x28] sm:$0xff] %v866_v0  ;;  %v1678_v1 = vmul.f32 %v1677_v21, %v1675_v4  ;;  %v719_v61 = vadd.s32 %v718_v46, %v714_v33  ;;  %v3376_v45 = vshrl.u32 %v1503_v41, 5  ;;  %v975_v47 = vshrl.u32 %v974_v59, 23 }
 0x22b   :  { %v1506_v56 = vsub.s32 32, %v1505_v11  ;;  %v1508_v22 = vshll.u32 %v2359_v20, %v1505_v11  ;;  %v1511_v27 = vshll.u32 %v2360_v24, %v1505_v11  ;;  %v1514_v3 = vshll.u32 %v2361_v26, %v1505_v11 }
 0x22c   :  { %v1679_v53 = vxor.u32 2147483648, %v1678_v1  ;;  %v720_v62 = vadd.s32 536870912, %v719_v61  ;;  %v1517_v31 = vshll.u32 %v2362_v28, %v1505_v11  ;;  %v1520_v38 = vshll.u32 %v2363_v30, %v1505_v11 }
 0x22d   :  { %v1509_v42 = vshrl.u32 %v2360_v24, %v1506_v56  ;;  %v1512_v60 = vshrl.u32 %v2361_v26, %v1506_v56  ;;  %v1515_v17 = vshrl.u32 %v2362_v28, %v1506_v56  ;;  %v1518_v58 = vshrl.u32 %v2363_v30, %v1506_v56 }
 0x22e   :  { %v1680_v49 = vsel %vm1597_vm8, %v1679_v53, %v1678_v1  ;;  %v721_v54 = vshrl.u32 %v720_v62, 30  ;;  %v1521_v55 = vshrl.u32 %v2364_v37, %v1506_v56  ;;  %v1689_v8 = vand.u32 3, %v1688_v12 }
 0x22f   :  { %v1683_v19 = vsel %vm3336_vm9, %v3151_v16, %v1680_v49  ;;  %v1510_v32 = vor.u32 %v1509_v42, %v1508_v22  ;;  %v1513_v9 = vor.u32 %v1512_v60, %v1511_v27  ;;  %v1519_v35 = vor.u32 %v1518_v58, %v1517_v31 }
 0x230   :  { %2253 = vcosq.f32 %v1683_v19  ;;  %v722_v25 = vshll.u32 %v721_v54, 30  ;;  %v1516_v2 = vor.u32 %v1515_v17, %v1514_v3  ;;  %v1522_v29 = vor.u32 %v1521_v55, %v1520_v38 }
 0x231   :  { %2255 = vsinq.f32 %v1683_v19  ;;  %vm1523_vm5 = vcmp.lt.s32.totalorder %v3376_v45, 1  ;;  %vm1526_vm6 = vcmp.lt.s32.totalorder %v3376_v45, 4  ;;  %v1539_v14 = vshll.u32 %v1499_v34, 8 }
 0x232   :  { %v3393_v57 = vsub.s32 %v719_v61, %v722_v25  ;;  %v1531_v6 = vsel %vm1523_vm5, %v1510_v32, %v1513_v9  ;;  %v1970_v43 = vadd.s32 4294967169, %v975_v47  ;;  %vm1524_vm7 = vcmp.lt.s32.totalorder %v3376_v45, 2 }
 0x233   :  { %vm1525_vm8 = vcmp.lt.s32.totalorder %v3376_v45, 3  ;;  %v1532_v18 = vsel %vm1526_vm6, %v1519_v35, 920167782  ;;  %v1528_v50 = vsel %vm1526_vm6, %v1516_v2, 2102212464  ;;  %v1535_v15 = vsel %vm1523_vm5, %v1513_v9, %v1516_v2 }
 0x234   :  { %v725_v13 = vsub.s32 0, %v3393_v57  ;;  %v1533_v33 = vsel %vm1525_vm8, %v1516_v2, %v1532_v18  ;;  %v1536_v36 = vsel %vm1526_vm6, %v1522_v29, 1326507024  ;;  %v1507_v10 = vshrl.u32 %v2359_v20, %v1506_v56 }
 0x235   :  { %v1534_v4 = vsel %vm1524_vm7, %v1531_v6, %v1533_v33  ;;  %v1537_v21 = vsel %vm1525_vm8, %v1519_v35, %v1536_v36  ;;  %vm1687_vm9 = vweird.f32 %v3151_v16  ;;  %vm661_vm10 = vcmp.lt.s32.totalorder %v3253_v52, 0 }
 0x236   :  { %v1959_v59 = vmin.u32 %v725_v13, %v3393_v57  ;;  %v1538_v41 = vsel %vm1524_vm7, %v1535_v15, %v1537_v21  ;;  %v3416_v0 = vmul.u32.u64.low %v1539_v14, %v1534_v4  ;;  %v3417_v46 = vmul.u32.u64.high %v1539_v14, %v1534_v4, %v3416_v0 }
 0x237   :  { %v1527_v1 = vsel %vm1523_vm5, %v1507_v10, %v1510_v32  ;;  %v1529_v12 = vsel %vm1525_vm8, %v1513_v9, %v1528_v50  ;;  %v971_v61 = vand.u32 2147483647, %v3308_v51  ;;  %v745_v34 = vsub.s32 4, %v721_v54 }
 0x238   :  { %v727_v11 = vclz %v1959_v59  ;;  %v3425_v56 = vmul.u32.u64.low %v1539_v14, %v1538_v41  ;;  %v3426_v22 = vmul.u32.u64.high %v1539_v14, %v1538_v41, %v3425_v56  ;;  %v981_v47 = vadd.s32 1, %v1970_v43 }
 0x239   :  { %vm1690_vm11 = vcmp.lt.s32.totalorder %v1689_v8, 2  ;;  %vm1691_vm12 = vcmp.eq.s32.totalorder %v1689_v8, 0  ;;  %vm1694_vm13 = vcmp.eq.s32.totalorder %v1689_v8, 2  ;;  %v1530_v42 = vsel %vm1524_vm7, %v1527_v1, %v1529_v12 }
 0x23a   :  { %v2254_v53 = vpop.eup %2253  ;;  %v1960_v62 = vadd.s32 4294967294, %v727_v11  ;;  %v1549_v60 = vadd.s32 1, %v3417_v46  ;;  %vm982_vm15 = vcmp.gt.s32.totalorder %v981_v47, 0  ;;  %v715_v31 = vadd.s32 %v3355_v48, %v3352_v40 }
 0x23b   :  { %v2256_v27 = vpop.eup %2255  ;;  %v1695_v3 = vxor.u32 2147483648, %v2254_v53  ;;  %v983_v49 = vsel %vm982_vm15, %v981_v47, 0  ;;  %v746_v19 = vsel %vm661_vm10, %v745_v34, %v721_v54  ;;  %vm1548_vm0 = vc.u32 %v3426_v22, %v3416_v0 }
 0x23c   :  { %v1692_v17 = vxor.u32 2147483648, %v2256_v27  ;;  %vm1961_vm14 = vcmp.lt.s32.totalorder %v1960_v62, 0  ;;  %v1546_v38 = vmul.u32 %v1539_v14, %v1530_v42  ;;  %v1550_v40 = vsel %vm1548_vm0, %v1549_v60, %v3417_v46 }
 0x23d   :  { %v1696_v58 = vsel %vm1694_vm13, %v1695_v3, %v2256_v27  ;;  %v730_v55 = vsel %vm1961_vm14, 0, %v1960_v62  ;;  %v985_v48 = vand.u32 31, %v983_v49  ;;  %vm3445_vm1 = vcmp.le.f32.partialorder %v659_v44, 0.7853982 }
 0x23e   :  { %v1693_v45 = vsel %vm1691_vm12, %v2254_v53, %v1692_v17  ;;  %v731_v32 = vsub.s32 32, %v730_v55  ;;  %v735_v9 = vsub.s32 4294967266, %v730_v55  ;;  %v732_v35 = vshll.u32 %v3393_v57, %v730_v55  ;;  %v3452_v57 = vld [vmem:[%s3757_s2] ss:$0 sm:$0xff]  ;;  %s2365_s2 = smov [#allocation7]  }
 0x23f   :  { %v1697_v25 = vsel %vm1690_vm11, %v1693_v45, %v1696_v58  ;;  %v1551_v6 = vadd.s32 %v1550_v40, %v1546_v38  ;;  %v986_v8 = vsub.s32 32, %v985_v48  ;;  %v224_v16 = vadd.f32 %v3452_v57, %v3000_v5  ;;  %s1928_s15 = sshll.u32 %s2365_s2, 4  ;;  %s1929_s15 = int_to_ptr.vmem [resolvable:$true] %s1928_s15 }
 0x240   :  { %v1698_v2 = vsel %vm1687_vm9, nan, %v1697_v25  ;;  %v733_v29 = vshrl.u32 %v715_v31, %v731_v32  ;;  %v736_v54 = vadd.s32 127, %v735_v9  ;;  %v978_v50 = vand.u32 8388607, %v971_v61  ;;  %s2327_s16 = scalar_lea.vmem %s1929_s15, 2048  ;;  %p2332_p3 = scmp.lt.s32.totalorder %s1929_s15, %s1929_s15 }
 0x241   :  { %1920 = vst [vmem:[#allocation7 + $0x68] sm:$0xff] %v1698_v2  ;;  %v1552_v18 = vadd.s32 536870912, %v1551_v6  ;;  %v748_v44 = vsel %vm3445_vm1, 0, %v746_v19  ;;  %v988_v33 = vshll.u32 %v2359_v20, %v985_v48  ;;  %v989_v15 = vshrl.u32 %v2360_v24, %v986_v8  ;;  %p2328_p2 = scmp.ne.s32.totalorder %s1929_s15, %s2327_s16  ;;  %p2333_p4 = scmp.lt.s32.totalorder %s2327_s16, %s2327_s16 }
 0x242   :  { %v734_v14 = vor.u32 %v733_v29, %v732_v35  ;;  %v737_v13 = vshll.u32 %v736_v54, 23  ;;  %v992_v36 = vshrl.u32 %v2361_v26, %v986_v8  ;;  %v995_v4 = vshrl.u32 %v2362_v28, %v986_v8 }
 0x243   :  { %v1553_v10 = vshrl.u32 %v1552_v18, 30  ;;  %v998_v5 = vshrl.u32 %v2363_v30, %v986_v8  ;;  %v984_v21 = vshrl.u32 %v983_v49, 5  ;;  %v991_v41 = vshll.u32 %v2360_v24, %v985_v48  ;;  %p2334_p5 = por %p2333_p4, %p2332_p3 }
 0x244   :  { %v738_v59 = vor.u32 4788187, %v737_v13  ;;  %v994_v46 = vshll.u32 %v2361_v26, %v985_v48  ;;  %v997_v11 = vshll.u32 %v2362_v28, %v985_v48  ;;  %v741_v12 = vcvt.s32.f32 %v734_v14 }
 0x245   :  { %v1554_v34 = vshll.u32 %v1553_v10, 30  ;;  %v990_v56 = vor.u32 %v989_v15, %v988_v33  ;;  %v993_v47 = vor.u32 %v992_v36, %v991_v41  ;;  %v1000_v62 = vshll.u32 %v2363_v30, %v985_v48  ;;  %p2335_p6 = pnand %p2334_p5, %p2328_p2 }
 0x246   :  { %v739_v1 = vand.u32 2147483647, %v738_v59  ;;  %v999_v53 = vor.u32 %v998_v5, %v997_v11  ;;  %v1001_v27 = vshrl.u32 %v2364_v37, %v986_v8  ;;  %v752_v42 = vadd.s32 3, %v748_v44 }
 0x247   :  { %v3470_v60 = vsub.s32 %v1551_v6, %v1554_v34  ;;  %v996_v17 = vor.u32 %v995_v4, %v994_v46  ;;  %v979_v31 = vor.u32 8388608, %v978_v50  ;;  %v987_v49 = vshrl.u32 %v2359_v20, %v986_v8 }
 0x248   :  { %v742_v3 = vmul.f32 %v741_v12, %v739_v1  ;;  %v1002_v58 = vor.u32 %v1001_v27, %v1000_v62  ;;  %v3473_v55 = vmul.f32 30.0, %v224_v16  ;;  %vm1003_vm2 = vcmp.lt.s32.totalorder %v984_v21, 1 }
 0x249   :  { %v1557_v45 = vsub.s32 0, %v3470_v60  ;;  %vm1006_vm3 = vcmp.lt.s32.totalorder %v984_v21, 4  ;;  %vm1004_vm4 = vcmp.lt.s32.totalorder %v984_v21, 2  ;;  %vm1005_vm5 = vcmp.lt.s32.totalorder %v984_v21, 3 }
 0x24a   :  { %v743_v19 = vxor.u32 2147483648, %v742_v3  ;;  %v1011_v32 = vsel %vm1003_vm2, %v990_v56, %v993_v47  ;;  %v1012_v9 = vsel %vm1006_vm3, %v999_v53, 920167782  ;;  %v1008_v35 = vsel %vm1006_vm3, %v996_v17, 2102212464 }
 0x24b   :  { %v1991_v25 = vmin.u32 %v1557_v45, %v3470_v60  ;;  %v1013_v40 = vsel %vm1005_vm5, %v996_v17, %v1012_v9  ;;  %v1015_v29 = vsel %vm1003_vm2, %v993_v47, %v996_v17  ;;  %v1016_v54 = vsel %vm1006_vm3, %v1002_v58, 1326507024 }
 0x24c   :  { %v744_v38 = vsel %vm661_vm10, %v743_v19, %v742_v3  ;;  %v1014_v2 = vsel %vm1004_vm4, %v1011_v32, %v1013_v40  ;;  %v1577_v8 = vsub.s32 4, %v1553_v10  ;;  %v1019_v16 = vshll.u32 %v979_v31, 8 }
 0x24d   :  { %v747_v48 = vsel %vm3445_vm1, %v3253_v52, %v744_v38  ;;  %v1559_v6 = vclz %v1991_v25  ;;  %v1007_v14 = vsel %vm1003_vm2, %v987_v49, %v990_v56  ;;  %v1009_v13 = vsel %vm1005_vm5, %v993_v47, %v1008_v35 }
 0x24e   :  { %2257 = vcosq.f32 %v747_v48  ;;  %v1017_v18 = vsel %vm1005_vm5, %v999_v53, %v1016_v54  ;;  %v3490_v44 = vmul.u32.u64.low %v1019_v16, %v1014_v2  ;;  %v3491_v33 = vmul.u32.u64.high %v1019_v16, %v1014_v2, %v3490_v44 }
 0x24f   :  { %2259 = vsinq.f32 %v747_v48  ;;  %v1992_v50 = vadd.s32 4294967294, %v1559_v6  ;;  %v1018_v43 = vsel %vm1004_vm4, %v1015_v29, %v1017_v18  ;;  %vm1493_vm6 = vcmp.lt.s32.totalorder %v3300_v23, 0 }
 0x250   :  { %v3494_v15 = vmul.u32.u64.low %v1019_v16, %v1018_v43  ;;  %v3495_v36 = vmul.u32.u64.high %v1019_v16, %v1018_v43, %v3494_v15  ;;  %v1806_v59 = vand.u32 2139095040, %v3473_v55  ;;  %vm3500_vm7 = vcmp.le.f32.partialorder %v1491_v63, 0.7853982 }
 0x251   :  { %vm1993_vm8 = vcmp.lt.s32.totalorder %v1992_v50, 0  ;;  %v1578_v5 = vsel %vm1493_vm6, %v1577_v8, %v1553_v10  ;;  %v1010_v41 = vsel %vm1004_vm4, %v1007_v14, %v1009_v13  ;;  %v753_v46 = vand.u32 3, %v752_v42 }
 0x252   :  { %v1562_v11 = vsel %vm1993_vm8, 0, %v1992_v50  ;;  %v1803_v1 = vand.u32 2147483647, %v3473_v55  ;;  %v1807_v12 = vshrl.u32 %v1806_v59, 23  ;;  %v1547_v34 = vadd.s32 %v3416_v0, %v3426_v22 }
 0x253   :  { %v1563_v56 = vsub.s32 32, %v1562_v11  ;;  %v1567_v47 = vsub.s32 4294967266, %v1562_v11  ;;  %v1029_v63 = vadd.s32 1, %v3491_v33  ;;  %v1580_v53 = vsel %vm3500_vm7, 0, %v1578_v5 }
 0x254   :  { %v1026_v62 = vmul.u32 %v1019_v16, %v1010_v41  ;;  %vm1028_vm9 = vc.u32 %v3495_v36, %v3490_v44  ;;  %v2002_v10 = vadd.s32 4294967169, %v1807_v12  ;;  %v1564_v21 = vshll.u32 %v3470_v60, %v1562_v11 }
 0x255   :  { %v1565_v27 = vshrl.u32 %v1547_v34, %v1563_v56  ;;  %v1568_v3 = vadd.s32 127, %v1567_v47  ;;  %v1030_v42 = vsel %vm1028_vm9, %v1029_v63, %v3491_v33  ;;  %v179_v0 = vadd.f32 %v3452_v57, %v3137_v39 }
 0x256   :  { %v1031_v17 = vadd.s32 %v1030_v42, %v1026_v62  ;;  %v1813_v31 = vadd.s32 1, %v2002_v10  ;;  %vm755_vm10 = vcmp.eq.s32.totalorder %v753_v46, 0  ;;  %vm758_vm11 = vcmp.eq.s32.totalorder %v753_v46, 2 }
 0x257   :  { %v1566_v49 = vor.u32 %v1565_v27, %v1564_v21  ;;  %v1569_v58 = vshll.u32 %v1568_v3, 23  ;;  %v1584_v32 = vadd.s32 3, %v1580_v53  ;;  %v1810_v25 = vand.u32 8388607, %v1803_v1 }
 0x258   :  { %v2258_v22 = vpop.eup %2257  ;;  %v1032_v9 = vadd.s32 536870912, %v1031_v17  ;;  %vm1814_vm12 = vcmp.gt.s32.totalorder %v1813_v31, 0  ;;  %v3522_v2 = vmul.f32 30.0, %v179_v0  ;;  %vm754_vm13 = vcmp.lt.s32.totalorder %v753_v46, 2 }
 0x259   :  { %v2260_v19 = vpop.eup %2259  ;;  %v759_v45 = vxor.u32 2147483648, %v2258_v22  ;;  %v1570_v38 = vor.u32 4788187, %v1569_v58  ;;  %v1815_v35 = vsel %vm1814_vm12, %v1813_v31, 0  ;;  %v1573_v6 = vcvt.s32.f32 %v1566_v49 }
 0x25a   :  { %v756_v60 = vxor.u32 2147483648, %v2260_v19  ;;  %v3520_v48 = vshrl.u32 %v1032_v9, 30  ;;  %v1817_v39 = vand.u32 31, %v1815_v35  ;;  %vm751_vm15 = vweird.f32 %v3253_v52 }
 0x25b   :  { %v760_v40 = vsel %vm758_vm11, %v759_v45, %v2260_v19  ;;  %v1571_v54 = vand.u32 2147483647, %v1570_v38  ;;  %v3527_v50 = vand.u32 3, %v1584_v32  ;;  %v1027_v43 = vadd.s32 %v3490_v44, %v3495_v36 }
 0x25c   :  { %v757_v29 = vsel %vm755_vm10, %v2258_v22, %v756_v60  ;;  %v1034_v16 = vshll.u32 %v3520_v48, 30  ;;  %v1818_v14 = vsub.s32 32, %v1817_v39  ;;  %v1811_v15 = vor.u32 8388608, %v1810_v25 }
 0x25d   :  { %v761_v8 = vsel %vm754_vm13, %v757_v29, %v760_v40  ;;  %v1574_v18 = vmul.f32 %v1573_v6, %v1571_v54  ;;  %v870_v5 = vand.u32 2139095040, %v3522_v2  ;;  %v3534_v52 = vshrl.u32 %v1815_v35, 5 }
 0x25e   :  { %v762_v13 = vsel %vm751_vm15, nan, %v761_v8  ;;  %v3530_v33 = vsub.s32 %v1031_v17, %v1034_v16  ;;  %v1821_v59 = vshrl.u32 %v2360_v24, %v1818_v14  ;;  %v1820_v46 = vshll.u32 %v2359_v20, %v1817_v39 }
 0x25f   :  { %1911 = vst [vmem:[#allocation7 + $0x20] sm:$0xff] %v762_v13  ;;  %v1575_v41 = vxor.u32 2147483648, %v1574_v18  ;;  %v1824_v11 = vshrl.u32 %v2361_v26, %v1818_v14  ;;  %v1823_v34 = vshll.u32 %v2360_v24, %v1817_v39  ;;  %v1826_v44 = vshll.u32 %v2361_v26, %v1817_v39 }
 0x260   :  { %v1037_v12 = vsub.s32 0, %v3530_v33  ;;  %v1827_v36 = vshrl.u32 %v2362_v28, %v1818_v14  ;;  %v1822_v47 = vor.u32 %v1821_v59, %v1820_v46  ;;  %v1829_v63 = vshll.u32 %v2362_v28, %v1817_v39 }
 0x261   :  { %v1576_v56 = vsel %vm1493_vm6, %v1575_v41, %v1574_v18  ;;  %v1830_v53 = vshrl.u32 %v2363_v30, %v1818_v14  ;;  %v1825_v21 = vor.u32 %v1824_v11, %v1823_v34  ;;  %v1832_v42 = vshll.u32 %v2363_v30, %v1817_v39 }
 0x262   :  { %v1579_v62 = vsel %vm3500_vm7, %v3300_v23, %v1576_v56  ;;  %v1971_v10 = vmin.u32 %v1037_v12, %v3530_v33  ;;  %v1828_v27 = vor.u32 %v1827_v36, %v1826_v44  ;;  %v1833_v17 = vshrl.u32 %v2364_v37, %v1818_v14 }
 0x263   :  { %2261 = vcosq.f32 %v1579_v62  ;;  %v1831_v3 = vor.u32 %v1830_v53, %v1829_v63  ;;  %vm973_vm14 = vcmp.lt.s32.totalorder %v3308_v51, 0  ;;  %v3553_v0 = vshll.u32 %v1811_v15, 8 }
 0x264   :  { %2263 = vsinq.f32 %v1579_v62  ;;  %v1039_v31 = vclz %v1971_v10  ;;  %v867_v22 = vand.u32 2147483647, %v3522_v2  ;;  %v1057_v4 = vsub.s32 4, %v3520_v48 }
 0x265   :  { %v1819_v49 = vshrl.u32 %v2359_v20, %v1818_v14  ;;  %v1834_v58 = vor.u32 %v1833_v17, %v1832_v42  ;;  %v871_v19 = vshrl.u32 %v870_v5, 23  ;;  %vm1835_vm0 = vcmp.lt.s32.totalorder %v3534_v52, 1 }
 0x266   :  { %v1972_v45 = vadd.s32 4294967294, %v1039_v31  ;;  %vm1837_vm1 = vcmp.lt.s32.totalorder %v3534_v52, 3  ;;  %vm1838_vm2 = vcmp.lt.s32.totalorder %v3534_v52, 4  ;;  %v1843_v9 = vsel %vm1835_vm0, %v1822_v47, %v1825_v21 }
 0x267   :  { %v1840_v32 = vsel %vm1838_vm2, %v1828_v27, 2102212464  ;;  %v1844_v60 = vsel %vm1838_vm2, %v1831_v3, 920167782  ;;  %v1847_v38 = vsel %vm1835_vm0, %v1825_v21, %v1828_v27  ;;  %vm3563_vm3 = vcmp.le.f32.partialorder %v971_v61, 0.7853982 }
 0x268   :  { %vm1973_vm4 = vcmp.lt.s32.totalorder %v1972_v45, 0  ;;  %vm1836_vm5 = vcmp.lt.s32.totalorder %v3534_v52, 2  ;;  %v1845_v35 = vsel %vm1837_vm1, %v1828_v27, %v1844_v60  ;;  %v1848_v40 = vsel %vm1838_vm2, %v1834_v58, 1326507024 }
 0x269   :  { %vm1586_vm6 = vcmp.lt.s32.totalorder %v3527_v50, 2  ;;  %v1042_v39 = vsel %vm1973_vm4, 0, %v1972_v45  ;;  %v1839_v29 = vsel %vm1835_vm0, %v1819_v49, %v1822_v47  ;;  %v1846_v54 = vsel %vm1836_vm5, %v1843_v9, %v1845_v35 }
 0x26a   :  { %v1849_v61 = vsel %vm1837_vm1, %v1831_v3, %v1848_v40  ;;  %vm1583_vm7 = vweird.f32 %v3300_v23  ;;  %v1043_v6 = vsub.s32 32, %v1042_v39  ;;  %v1047_v8 = vsub.s32 4294967266, %v1042_v39 }
 0x26b   :  { %v1841_v16 = vsel %vm1837_vm1, %v1825_v21, %v1840_v32  ;;  %v1850_v14 = vsel %vm1836_vm5, %v1847_v38, %v1849_v61  ;;  %v3585_v15 = vmul.u32.u64.low %v3553_v0, %v1846_v54  ;;  %v3586_v59 = vmul.u32.u64.high %v3553_v0, %v1846_v54, %v3585_v15 }
 0x26c   :  { %v3581_v13 = vmul.u32.u64.low %v3553_v0, %v1850_v14  ;;  %v3582_v18 = vmul.u32.u64.high %v3553_v0, %v1850_v14, %v3581_v13  ;;  %v1044_v5 = vshll.u32 %v3530_v33, %v1042_v39  ;;  %v1045_v41 = vshrl.u32 %v1027_v43, %v1043_v6 }
 0x26d   :  { %v1048_v46 = vadd.s32 127, %v1047_v8  ;;  %v1966_v11 = vadd.s32 4294967169, %v871_v19  ;;  %v2262_v12 = vpop.eup %2261  ;;  %vm1587_vm8 = vcmp.eq.s32.totalorder %v3527_v50, 0  ;;  %vm1590_vm9 = vcmp.eq.s32.totalorder %v3527_v50, 2 }
 0x26e   :  { %v1058_v34 = vsel %vm973_vm14, %v1057_v4, %v3520_v48  ;;  %v1842_v44 = vsel %vm1836_vm5, %v1839_v29, %v1841_v16  ;;  %v2264_v36 = vpop.eup %2263  ;;  %v1591_v56 = vxor.u32 2147483648, %v2262_v12  ;;  %v1046_v47 = vor.u32 %v1045_v41, %v1044_v5 }
 0x26f   :  { %v1049_v63 = vshll.u32 %v1048_v46, 23  ;;  %v877_v33 = vadd.s32 1, %v1966_v11  ;;  %v1588_v43 = vxor.u32 2147483648, %v2264_v36  ;;  %vm1860_vm10 = vc.u32 %v3582_v18, %v3585_v15 }
 0x270   :  { %v1861_v53 = vadd.s32 1, %v3586_v59  ;;  %v874_v62 = vand.u32 8388607, %v867_v22  ;;  %v1592_v10 = vsel %vm1590_vm9, %v1591_v56, %v2264_v36  ;;  %v1858_v48 = vmul.u32 %v3553_v0, %v1842_v44 }
 0x271   :  { %v1050_v21 = vor.u32 4788187, %v1049_v63  ;;  %vm878_vm11 = vcmp.gt.s32.totalorder %v877_v33, 0  ;;  %v1589_v52 = vsel %vm1587_vm8, %v2262_v12, %v1588_v43  ;;  %v1060_v27 = vsel %vm3563_vm3, 0, %v1058_v34 }
 0x272   :  { %v1862_v3 = vsel %vm1860_vm10, %v1861_v53, %v3586_v59  ;;  %v879_v42 = vsel %vm878_vm11, %v877_v33, 0  ;;  %v1593_v17 = vsel %vm1586_vm6, %v1589_v52, %v1592_v10  ;;  %v1053_v4 = vcvt.s32.f32 %v1046_v47 }
 0x273   :  { %v1051_v31 = vand.u32 2147483647, %v1050_v21  ;;  %v1863_v49 = vadd.s32 %v1862_v3, %v1858_v48  ;;  %v1594_v58 = vsel %vm1583_vm7, nan, %v1593_v17  ;;  %v881_v0 = vand.u32 31, %v879_v42 }
 0x274   :  { %1919 = vst [vmem:[#allocation7 + $0x60] sm:$0xff] %v1594_v58  ;;  %v219_v32 = vadd.f32 %v3452_v57, %v3192_v7  ;;  %v1064_v9 = vadd.s32 3, %v1060_v27  ;;  %v875_v60 = vor.u32 8388608, %v874_v62  ;;  %v880_v38 = vshrl.u32 %v879_v42, 5 }
 0x275   :  { %v1054_v19 = vmul.f32 %v1053_v4, %v1051_v31  ;;  %v1864_v45 = vadd.s32 536870912, %v1863_v49  ;;  %v882_v35 = vsub.s32 32, %v881_v0  ;;  %v884_v39 = vshll.u32 %v2359_v20, %v881_v0 }
 0x276   :  { %v887_v29 = vshll.u32 %v2360_v24, %v881_v0  ;;  %v890_v61 = vshll.u32 %v2361_v26, %v881_v0  ;;  %v893_v8 = vshll.u32 %v2362_v28, %v881_v0  ;;  %v1065_v41 = vand.u32 3, %v1064_v9 }
 0x277   :  { %v1055_v40 = vxor.u32 2147483648, %v1054_v19  ;;  %v3614_v50 = vshrl.u32 %v1864_v45, 30  ;;  %v885_v23 = vshrl.u32 %v2360_v24, %v882_v35  ;;  %v888_v54 = vshrl.u32 %v2361_v26, %v882_v35 }
 0x278   :  { %v891_v6 = vshrl.u32 %v2362_v28, %v882_v35  ;;  %v894_v16 = vshrl.u32 %v2363_v30, %v882_v35  ;;  %v896_v12 = vshll.u32 %v2363_v30, %v881_v0  ;;  %v897_v34 = vshrl.u32 %v2364_v37, %v882_v35 }
 0x279   :  { %v1056_v7 = vsel %vm973_vm14, %v1055_v40, %v1054_v19  ;;  %v1866_v57 = vshll.u32 %v3614_v50, 30  ;;  %v886_v13 = vor.u32 %v885_v23, %v884_v39  ;;  %v889_v59 = vor.u32 %v888_v54, %v887_v29 }
 0x27a   :  { %v1059_v14 = vsel %vm3563_vm3, %v3308_v51, %v1056_v7  ;;  %v892_v5 = vor.u32 %v891_v6, %v890_v61  ;;  %v895_v11 = vor.u32 %v894_v16, %v893_v8  ;;  %v3634_v44 = vmul.f32 30.0, %v219_v32 }
 0x27b   :  { %2265 = vcosq.f32 %v1059_v14  ;;  %v3630_v46 = vsub.s32 %v1863_v49, %v1866_v57  ;;  %vm899_vm12 = vcmp.lt.s32.totalorder %v880_v38, 1  ;;  %vm901_vm13 = vcmp.lt.s32.totalorder %v880_v38, 3 }
 0x27c   :  { %2267 = vsinq.f32 %v1059_v14  ;;  %vm902_vm15 = vcmp.lt.s32.totalorder %v880_v38, 4  ;;  %v898_v25 = vor.u32 %v897_v34, %v896_v12  ;;  %v907_v47 = vsel %vm899_vm12, %v886_v13, %v889_v59 }
 0x27d   :  { %v1869_v36 = vsub.s32 0, %v3630_v46  ;;  %v904_v56 = vsel %vm902_vm15, %v892_v5, 2102212464  ;;  %v908_v63 = vsel %vm902_vm15, %v895_v11, 920167782  ;;  %v883_v43 = vshrl.u32 %v2359_v20, %v882_v35 }
 0x27e   :  { %vm900_vm14 = vcmp.lt.s32.totalorder %v880_v38, 2  ;;  %v909_v53 = vsel %vm901_vm13, %v892_v5, %v908_v63  ;;  %v911_v10 = vsel %vm899_vm12, %v889_v59, %v892_v5  ;;  %v912_v21 = vsel %vm902_vm15, %v898_v25, 1326507024 }
 0x27f   :  { %v2003_v33 = vmin.u32 %v1869_v36, %v3630_v46  ;;  %v910_v62 = vsel %vm900_vm14, %v907_v47, %v909_v53  ;;  %v915_v48 = vshll.u32 %v875_v60, 8  ;;  %v903_v27 = vsel %vm899_vm12, %v883_v43, %v886_v13 }
 0x280   :  { %v905_v3 = vsel %vm901_vm13, %v889_v59, %v904_v56  ;;  %v913_v42 = vsel %vm901_vm13, %v895_v11, %v912_v21  ;;  %vm1066_vm0 = vcmp.lt.s32.totalorder %v1065_v41, 2  ;;  %v1702_v58 = vand.u32 2139095040, %v3634_v44 }
 0x281   :  { %v1871_v52 = vclz %v2003_v33  ;;  %v3646_v17 = vmul.u32.u64.low %v915_v48, %v910_v62  ;;  %v3647_v31 = vmul.u32.u64.high %v915_v48, %v910_v62, %v3646_v17  ;;  %v914_v49 = vsel %vm900_vm14, %v911_v10, %v913_v42 }
 0x282   :  { %vm1067_vm1 = vcmp.eq.s32.totalorder %v1065_v41, 0  ;;  %v906_v0 = vsel %vm900_vm14, %v903_v27, %v905_v3  ;;  %v3653_v19 = vmul.u32.u64.low %v915_v48, %v914_v49  ;;  %v3654_v45 = vmul.u32.u64.high %v915_v48, %v914_v49, %v3653_v19 }
 0x283   :  { %v2004_v4 = vadd.s32 4294967294, %v1871_v52  ;;  %vm1070_vm2 = vcmp.eq.s32.totalorder %v1065_v41, 2  ;;  %v1859_v9 = vadd.s32 %v3585_v15, %v3582_v18  ;;  %v1703_v60 = vshrl.u32 %v1702_v58, 23 }
 0x284   :  { %v1889_v29 = vsub.s32 4, %v3614_v50  ;;  %v925_v23 = vadd.s32 1, %v3647_v31  ;;  %v922_v6 = vmul.u32 %v915_v48, %v906_v0  ;;  %vm924_vm4 = vc.u32 %v3654_v45, %v3646_v17 }
 0x285   :  { %v2266_v32 = vpop.eup %2265  ;;  %vm2005_vm3 = vcmp.lt.s32.totalorder %v2004_v4, 0  ;;  %v1998_v18 = vadd.s32 4294967169, %v1703_v60  ;;  %vm1063_vm5 = vweird.f32 %v3308_v51  ;;  %vm1805_vm6 = vcmp.lt.s32.totalorder %v3473_v55, 0 }
 0x286   :  { %v2268_v35 = vpop.eup %2267  ;;  %v1071_v40 = vxor.u32 2147483648, %v2266_v32  ;;  %v1874_v39 = vsel %vm2005_vm3, 0, %v2004_v4  ;;  %v926_v14 = vsel %vm924_vm4, %v925_v23, %v3647_v31  ;;  %v1890_v34 = vsel %vm1805_vm6, %v1889_v29, %v3614_v50 }
 0x287   :  { %v1068_v54 = vxor.u32 2147483648, %v2268_v35  ;;  %v1875_v38 = vsub.s32 32, %v1874_v39  ;;  %v1879_v61 = vsub.s32 4294967266, %v1874_v39  ;;  %v1876_v57 = vshll.u32 %v3630_v46, %v1874_v39 }
 0x288   :  { %v1072_v7 = vsel %vm1070_vm2, %v1071_v40, %v2268_v35  ;;  %v927_v59 = vadd.s32 %v926_v14, %v922_v6  ;;  %v1709_v5 = vadd.s32 1, %v1998_v18  ;;  %vm3673_vm8 = vcmp.le.f32.partialorder %v1803_v1, 0.7853982 }
 0x289   :  { %v1069_v15 = vsel %vm1067_vm1, %v2266_v32, %v1068_v54  ;;  %v1877_v8 = vshrl.u32 %v1859_v9, %v1875_v38  ;;  %v1880_v16 = vadd.s32 127, %v1879_v61  ;;  %v1699_v47 = vand.u32 2147483647, %v3634_v44 }
 0x28a   :  { %v1073_v13 = vsel %vm1066_vm0, %v1069_v15, %v1072_v7  ;;  %v928_v36 = vadd.s32 536870912, %v927_v59  ;;  %vm1710_vm7 = vcmp.gt.s32.totalorder %v1709_v5, 0  ;;  %v1892_v50 = vsel %vm3673_vm8, 0, %v1890_v34 }
 0x28b   :  { %v1074_v11 = vsel %vm1063_vm5, nan, %v1073_v13  ;;  %v1878_v46 = vor.u32 %v1877_v8, %v1876_v57  ;;  %v1881_v12 = vshll.u32 %v1880_v16, 23  ;;  %v1711_v56 = vsel %vm1710_vm7, %v1709_v5, 0 }
 0x28c   :  { %1914 = vst [vmem:[#allocation7 + $0x38] sm:$0xff] %v1074_v11  ;;  %v3677_v41 = vshrl.u32 %v928_v36, 30  ;;  %v1713_v63 = vand.u32 31, %v1711_v56  ;;  %v1896_v21 = vadd.s32 3, %v1892_v50  ;;  %v1706_v1 = vand.u32 8388607, %v1699_v47 }
 0x28d   :  { %v1882_v25 = vor.u32 4788187, %v1881_v12  ;;  %v1885_v43 = vcvt.s32.f32 %v1878_v46  ;;  %v1712_v32 = vshrl.u32 %v1711_v56, 5  ;;  %vm1895_vm1 = vweird.f32 %v3473_v55 }
 0x28e   :  { %v930_v53 = vshll.u32 %v3677_v41, 30  ;;  %v1714_v62 = vsub.s32 32, %v1713_v63  ;;  %v1716_v3 = vshll.u32 %v2359_v20, %v1713_v63  ;;  %v1719_v49 = vshll.u32 %v2360_v24, %v1713_v63 }
 0x28f   :  { %v1883_v33 = vand.u32 2147483647, %v1882_v25  ;;  %v1722_v58 = vshll.u32 %v2361_v26, %v1713_v63  ;;  %v1725_v60 = vshll.u32 %v2362_v28, %v1713_v63  ;;  %v1897_v54 = vand.u32 3, %v1896_v21 }
 0x290   :  { %v3683_v48 = vsub.s32 %v927_v59, %v930_v53  ;;  %v1717_v52 = vshrl.u32 %v2360_v24, %v1714_v62  ;;  %v1720_v42 = vshrl.u32 %v2361_v26, %v1714_v62  ;;  %v1723_v31 = vshrl.u32 %v2362_v28, %v1714_v62 }
 0x291   :  { %v1886_v10 = vmul.f32 %v1885_v43, %v1883_v33  ;;  %v1726_v0 = vshrl.u32 %v2363_v30, %v1714_v62  ;;  %v1728_v26 = vshll.u32 %v2363_v30, %v1713_v63  ;;  %v1729_v23 = vshrl.u32 %v2364_v37, %v1714_v62 }
 0x292   :  { %v933_v4 = vsub.s32 0, %v3683_v48  ;;  %v1718_v9 = vor.u32 %v1717_v52, %v1716_v3  ;;  %v1721_v39 = vor.u32 %v1720_v42, %v1719_v49  ;;  %v1724_v29 = vor.u32 %v1723_v31, %v1722_v58 }
 0x293   :  { %v1887_v27 = vxor.u32 2147483648, %v1886_v10  ;;  %v1727_v24 = vor.u32 %v1726_v0, %v1725_v60  ;;  %v1707_v61 = vor.u32 8388608, %v1706_v1  ;;  %v923_v28 = vadd.s32 %v3646_v17, %v3654_v45 }
 0x294   :  { %v1967_v40 = vmin.u32 %v933_v4, %v3683_v48  ;;  %v1715_v6 = vshrl.u32 %v2359_v20, %v1714_v62  ;;  %v1730_v7 = vor.u32 %v1729_v23, %v1728_v26  ;;  %vm1731_vm9 = vcmp.lt.s32.totalorder %v1712_v32, 1 }
 0x295   :  { %v1888_v19 = vsel %vm1805_vm6, %v1887_v27, %v1886_v10  ;;  %vm1733_vm10 = vcmp.lt.s32.totalorder %v1712_v32, 3  ;;  %vm1734_vm11 = vcmp.lt.s32.totalorder %v1712_v32, 4  ;;  %v1739_v18 = vsel %vm1731_vm9, %v1718_v9, %v1721_v39 }
 0x296   :  { %v1891_v35 = vsel %vm3673_vm8, %v3473_v55, %v1888_v19  ;;  %v935_v38 = vclz %v1967_v40  ;;  %v1736_v15 = vsel %vm1734_vm11, %v1724_v29, 2102212464  ;;  %v1740_v30 = vsel %vm1734_vm11, %v1727_v24, 920167782 }
 0x297   :  { %2269 = vcosq.f32 %v1891_v35  ;;  %v1743_v37 = vsel %vm1731_vm9, %v1721_v39, %v1724_v29  ;;  %v1744_v8 = vsel %vm1734_vm11, %v1730_v7, 1326507024  ;;  %vm1732_vm13 = vcmp.lt.s32.totalorder %v1712_v32, 2 }
 0x298   :  { %2271 = vsinq.f32 %v1891_v35  ;;  %v1968_v57 = vadd.s32 4294967294, %v935_v38  ;;  %v1741_v16 = vsel %vm1733_vm10, %v1724_v29, %v1740_v30  ;;  %v1745_v17 = vsel %vm1733_vm10, %v1727_v24, %v1744_v8 }
 0x299   :  { %v1742_v20 = vsel %vm1732_vm13, %v1739_v18, %v1741_v16  ;;  %v1746_v14 = vsel %vm1732_vm13, %v1743_v37, %v1745_v17  ;;  %v1747_v13 = vshll.u32 %v1707_v61, 8  ;;  %v1735_v11 = vsel %vm1731_vm9, %v1715_v6, %v1718_v9 }
 0x29a   :  { %vm1969_vm12 = vcmp.lt.s32.totalorder %v1968_v57, 0  ;;  %v1737_v46 = vsel %vm1733_vm10, %v1721_v39, %v1736_v15  ;;  %vm1902_vm15 = vcmp.eq.s32.totalorder %v1897_v54, 2  ;;  %vm1899_vm0 = vcmp.eq.s32.totalorder %v1897_v54, 0 }
 0x29b   :  { %v938_v45 = vsel %vm1969_vm12, 0, %v1968_v57  ;;  %v3715_v12 = vmul.u32.u64.low %v1747_v13, %v1746_v14  ;;  %v3716_v34 = vmul.u32.u64.high %v1747_v13, %v1746_v14, %v3715_v12  ;;  %v1738_v43 = vsel %vm1732_vm13, %v1735_v11, %v1737_v46 }
 0x29c   :  { %v939_v59 = vsub.s32 32, %v938_v45  ;;  %v943_v5 = vsub.s32 4294967266, %v938_v45  ;;  %v3718_v36 = vmul.u32.u64.low %v1747_v13, %v1742_v20  ;;  %v3719_v25 = vmul.u32.u64.high %v1747_v13, %v1742_v20, %v3718_v36 }
 0x29d   :  { %v940_v56 = vshll.u32 %v3683_v48, %v938_v45  ;;  %v1754_v3 = vmul.u32 %v1747_v13, %v1738_v43  ;;  %vm1898_vm2 = vcmp.lt.s32.totalorder %v1897_v54, 2  ;;  %v953_v19 = vsub.s32 4, %v3677_v41 }
 0x29e   :  { %v941_v51 = vshrl.u32 %v923_v28, %v939_v59  ;;  %v944_v63 = vadd.s32 127, %v943_v5  ;;  %vm1756_vm14 = vc.u32 %v3716_v34, %v3718_v36  ;;  %v1757_v1 = vadd.s32 1, %v3719_v25 }
 0x29f   :  { %vm869_vm3 = vcmp.lt.s32.totalorder %v3522_v2, 0  ;;  %vm868_vm4 = vcmp.le.f32.partialorder %v867_v22, 0.7853982  ;;  %v1755_v15 = vadd.s32 %v3718_v36, %v3716_v34  ;;  %vm959_vm9 = vweird.f32 %v3522_v2 }
 0x2a0   :  { %v942_v62 = vor.u32 %v941_v51, %v940_v56  ;;  %v945_v10 = vshll.u32 %v944_v63, 23  ;;  %v1758_v42 = vsel %vm1756_vm14, %v1757_v1, %v3719_v25  ;;  %v954_v55 = vsel %vm869_vm3, %v953_v19, %v3677_v41 }
 0x2a1   :  { %v2270_v33 = vpop.eup %2269  ;;  %v1759_v58 = vadd.s32 %v1758_v42, %v1754_v3  ;;  %v956_v24 = vsel %vm868_vm4, 0, %v954_v55  ;;  %vm1701_vm10 = vcmp.lt.s32.totalorder %v3634_v44, 0  ;;  %vm1700_vm11 = vcmp.le.f32.partialorder %v1699_v47, 0.7853982 }
 0x2a2   :  { %v2272_v50 = vpop.eup %2271  ;;  %v1903_v53 = vxor.u32 2147483648, %v2270_v33  ;;  %v946_v27 = vor.u32 4788187, %v945_v10  ;;  %v949_v49 = vcvt.s32.f32 %v942_v62  ;;  %v960_v54 = vadd.s32 3, %v956_v24 }
 0x2a3   :  { %v1900_v21 = vxor.u32 2147483648, %v2272_v50  ;;  %v1760_v9 = vadd.s32 536870912, %v1759_v58  ;;  %vm1791_vm14 = vweird.f32 %v3634_v44 }
 0x2a4   :  { %v1904_v52 = vsel %vm1902_vm15, %v1903_v53, %v2272_v50  ;;  %v947_v4 = vand.u32 2147483647, %v946_v27  ;;  %v961_v28 = vand.u32 3, %v960_v54 }
 0x2a5   :  { %v1901_v48 = vsel %vm1899_vm0, %v2270_v33, %v1900_v21  ;;  %v1761_v35 = vshrl.u32 %v1760_v9, 30 }
 0x2a6   :  { %v1905_v31 = vsel %vm1898_vm2, %v1901_v48, %v1904_v52  ;;  %v950_v32 = vmul.f32 %v949_v49, %v947_v4  ;;  %vm966_vm6 = vcmp.eq.s32.totalorder %v961_v28, 2  ;;  %vm962_vm7 = vcmp.lt.s32.totalorder %v961_v28, 2 }
 0x2a7   :  { %v1906_v0 = vsel %vm1895_vm1, nan, %v1905_v31  ;;  %v1762_v39 = vshll.u32 %v1761_v35, 30  ;;  %vm963_vm8 = vcmp.eq.s32.totalorder %v961_v28, 0  ;;  %v1785_v36 = vsub.s32 4, %v1761_v35 }
 0x2a8   :  { %1922 = vst [vmem:[#allocation7 + $0x78] sm:$0xff] %v1906_v0  ;;  %v951_v60 = vxor.u32 2147483648, %v950_v32 }
 0x2a9   :  { %v1763_v26 = vsub.s32 %v1759_v58, %v1762_v39  ;;  %v1786_v51 = vsel %vm1701_vm10, %v1785_v36, %v1761_v35 }
 0x2aa   :  { %v952_v40 = vsel %vm869_vm3, %v951_v60, %v950_v32  ;;  %v1788_v63 = vsel %vm1700_vm11, 0, %v1786_v51 }
 0x2ab   :  { %v955_v29 = vsel %vm868_vm4, %v3522_v2, %v952_v40  ;;  %v1765_v23 = vsub.s32 0, %v1763_v26  ;;  %v1792_v33 = vadd.s32 3, %v1788_v63 }
 0x2ac   :  { %2273 = vcosq.f32 %v955_v29 }
 0x2ad   :  { %2275 = vsinq.f32 %v955_v29  ;;  %v1999_v38 = vmin.u32 %v1765_v23, %v1763_v26  ;;  %v1793_v43 = vand.u32 3, %v1792_v33 }
 0x2af   :  { %v1767_v61 = vclz %v1999_v38  ;;  %vm1798_vm12 = vcmp.eq.s32.totalorder %v1793_v43, 2  ;;  %vm1795_vm13 = vcmp.eq.s32.totalorder %v1793_v43, 0  ;;  %vm1794_vm15 = vcmp.lt.s32.totalorder %v1793_v43, 2 }
 0x2b1   :  { %v2000_v6 = vadd.s32 4294967294, %v1767_v61 }
 0x2b3   :  { %vm2001_vm5 = vcmp.lt.s32.totalorder %v2000_v6, 0 }
 0x2b4   :  { %v1770_v22 = vsel %vm2001_vm5, 0, %v2000_v6 }
 0x2b5   :  { %v1771_v30 = vsub.s32 32, %v1770_v22  ;;  %v1775_v37 = vsub.s32 4294967266, %v1770_v22  ;;  %v1772_v17 = vshll.u32 %v1763_v26, %v1770_v22 }
 0x2b6   :  { %v2274_v7 = vpop.eup %2273 }
 0x2b7   :  { %v2276_v41 = vpop.eup %2275  ;;  %v967_v57 = vxor.u32 2147483648, %v2274_v7  ;;  %v1773_v45 = vshrl.u32 %v1755_v15, %v1771_v30  ;;  %v1776_v20 = vadd.s32 127, %v1775_v37 }
 0x2b8   :  { %v964_v18 = vxor.u32 2147483648, %v2276_v41 }
 0x2b9   :  { %v968_v8 = vsel %vm966_vm6, %v967_v57, %v2276_v41  ;;  %v1774_v59 = vor.u32 %v1773_v45, %v1772_v17  ;;  %v1777_v5 = vshll.u32 %v1776_v20, 23 }
 0x2ba   :  { %v965_v16 = vsel %vm963_vm8, %v2274_v7, %v964_v18 }
 0x2bb   :  { %v969_v14 = vsel %vm962_vm7, %v965_v16, %v968_v8  ;;  %v1778_v11 = vor.u32 4788187, %v1777_v5  ;;  %v1781_v12 = vcvt.s32.f32 %v1774_v59 }
 0x2bc   :  { %v970_v13 = vsel %vm959_vm9, nan, %v969_v14 }
 0x2bd   :  { %1913 = vst [vmem:[#allocation7 + $0x30] sm:$0xff] %v970_v13  ;;  %v1779_v46 = vand.u32 2147483647, %v1778_v11 }
 0x2bf   :  { %v1782_v34 = vmul.f32 %v1781_v12, %v1779_v46 }
 0x2c1   :  { %v1783_v25 = vxor.u32 2147483648, %v1782_v34 }
 0x2c3   :  { %v1784_v56 = vsel %vm1701_vm10, %v1783_v25, %v1782_v34 }
 0x2c4   :  { %v1787_v2 = vsel %vm1700_vm11, %v3634_v44, %v1784_v56 }
 0x2c5   :  { %2277 = vcosq.f32 %v1787_v2 }
 0x2c6   :  { %2279 = vsinq.f32 %v1787_v2 }
 0x2cf   :  { %v2278_v50 = vpop.eup %2277 }
 0x2d0   :  { %v2280_v53 = vpop.eup %2279  ;;  %v1799_v62 = vxor.u32 2147483648, %v2278_v50 }
 0x2d1   :  { %v1796_v10 = vxor.u32 2147483648, %v2280_v53 }
 0x2d2   :  { %v1800_v21 = vsel %vm1798_vm12, %v1799_v62, %v2280_v53 }
 0x2d3   :  { %v1797_v47 = vsel %vm1795_vm13, %v2278_v50, %v1796_v10 }
 0x2d4   :  { %v1801_v1 = vsel %vm1794_vm15, %v1797_v47, %v1800_v21 }
 0x2d5   :  { %v1802_v52 = vsel %vm1791_vm14, nan, %v1801_v1 }
 0x2d6   :  { %1921 = vst [vmem:[#allocation7 + $0x70] sm:$0xff] %v1802_v52 }
 0x2d7   :  { %2338 = shalt.err (!%p2335_p6)
}
 0x2d8   :  { %s2339_s19 = scalar_lea.hbm %s3758_s3, 2048 }
 0x2d9   :  { %p2340_p7 = scmp.ne.s32.totalorder %s3758_s3, %s2339_s19  ;;  %p2343_p8 = scmp.lt.u32.totalorder %s2339_s19, %s3758_s3 }
 0x2db   :  { %p2345_p9 = pnand %p2343_p8, %p2340_p7 }
 0x2dd   :  { %2348 = shalt.err (!%p2345_p9)
}
 0x2de   :  { %1934 = dma.vmem_to_hbm [thread:$0]  %s1929_s15, 2048, %s3758_s3, [#allocation4], %s2356_s22, %s2356_s22, %s2357_s23  }
 0x2df   :  { %2353 = dma.done.wait [#allocation4], 2048  }
 0x2e0   :  { %2354 = vsyncadd [#allocation4], 4294965248 }
 0x2e1   :  { %1938 = vsyncpa [#allocation3], 1 }
 0x2e2   :  { %1939 = vsyncpa [#allocation6], 1 }
 0x2e3   :  { %1940 = vsyncpa [#allocation4], 1 }

</bundles_post_ra>
